<compile_context>
chip_gen: v5e
topology: v5e:2x2
jax: 0.10.0
libtpu: 0.0.40
codegen_flags: <defaults>
</compile_context>

<pallas_src>
import functools

import jax
import jax.numpy as jnp
from jax import lax
from jax.experimental import pallas as pl
from jax.experimental.pallas import tpu as pltpu


def _coral_kernel(s0_ref, s1_ref, s2_ref, t_ref, loss_ref,
                  acc_ref, ssum_ref, tsum_ref,
                  *, src_rows, tgt_rows, tile, feat):
    k = pl.program_id(0)
    last = pl.num_programs(0) - 1

    @pl.when(k == 0)
    def _init():
        acc_ref[...] = jnp.zeros_like(acc_ref)
        ssum_ref[...] = jnp.zeros_like(ssum_ref)
        tsum_ref[...] = jnp.zeros_like(tsum_ref)

    # contract over the sample axis: X^T X without materializing X.T
    contract0 = (((0,), (0,)), ((), ()))

    def accumulate(ref, rows, sum_ref, subtract=False):
        tiles = pl.cdiv(rows, tile)

        @pl.when(k < tiles)
        def _():
            x = ref[...].astype(jnp.float32)                      # [tile, D]
            if rows % tile != 0:
                # mask garbage tail rows of the final (partial) tile
                row_id = lax.broadcasted_iota(jnp.int32, (tile, feat), 0)
                x = jnp.where(row_id < rows - k * tile, x, 0.0)
            gram = lax.dot_general(x, x, contract0,
                                   preferred_element_type=jnp.float32)  # [D, D]
            if subtract:
                acc_ref[...] -= gram
            else:
                acc_ref[...] += gram
            sum_ref[...] += jnp.sum(x, axis=0, keepdims=True)     # [1, D]

    # fused accumulation: source grams add, target gram subtracts
    accumulate(s0_ref, src_rows[0], ssum_ref)
    accumulate(s1_ref, src_rows[1], ssum_ref)
    accumulate(s2_ref, src_rows[2], ssum_ref)
    accumulate(t_ref, tgt_rows, tsum_ref, subtract=True)

    @pl.when(k == last)
    def _finalize():
        n_s = float(sum(src_rows))
        n_t = float(tgt_rows)
        m_s = ssum_ref[...] * (1.0 / n_s)                          # [1, D]
        m_t = tsum_ref[...] * (1.0 / n_t)                          # [1, D]
        # cov_gram(X) = X^T X - n * m m^T ; outer products via dot_general (no .T)
        outer_s = lax.dot_general(m_s, m_s, contract0,
                                  preferred_element_type=jnp.float32)
        outer_t = lax.dot_general(m_t, m_t, contract0,
                                  preferred_element_type=jnp.float32)
        diff = acc_ref[...] - n_s * outer_s + n_t * outer_t        # xc - xct
        loss_ref[...] = jnp.mean(diff * diff).reshape(1, 1)


def _row_spec(rows, tile, feat):
    tiles = pl.cdiv(rows, tile)
    if tiles == 1:
        return pl.BlockSpec((tile, feat), lambda k: (0, 0))
    # clamp so inputs with fewer tiles than the grid never DMA out of bounds
    # (same block index => the DMA is skipped on repeated steps)
    return pl.BlockSpec((tile, feat),
                        lambda k, _t=tiles: (jnp.minimum(k, _t - 1), 0))


def coral_loss(source, target, *, tile_rows=128):
    """source: tuple/list of 3 arrays [n_i, D]; target: [M, D]. Returns scalar f32."""
    s0, s1, s2 = source
    feat = s0.shape[-1]
    assert s1.shape[-1] == feat and s2.shape[-1] == feat and target.shape[-1] == feat

    tile = int(tile_rows)
    assert tile % 8 == 0, "tile_rows must be a multiple of 8 (sublane)"

    src_rows = (s0.shape[0], s1.shape[0], s2.shape[0])
    tgt_rows = target.shape[0]
    num_steps = max(pl.cdiv(r, tile) for r in (*src_rows, tgt_rows))

    n_total = sum(src_rows) + tgt_rows
    itemsize = jnp.dtype(s0.dtype).itemsize
    cost = pl.CostEstimate(
        flops=2 * n_total * feat * feat + 4 * feat * feat + 3 * feat * feat,
        transcendentals=0,
        bytes_accessed=n_total * feat * itemsize + 4,
    )

    kernel = functools.partial(
        _coral_kernel,
        src_rows=src_rows, tgt_rows=tgt_rows, tile=tile, feat=feat)

    out = pl.pallas_call(
        kernel,
        out_shape=jax.ShapeDtypeStruct((1, 1), jnp.float32),
        grid=(num_steps,),
        in_specs=[_row_spec(r, tile, feat) for r in src_rows]
                 + [_row_spec(tgt_rows, tile, feat)],
        out_specs=pl.BlockSpec((1, 1), lambda k: (0, 0)),
        scratch_shapes=[
            pltpu.VMEM((feat, feat), jnp.float32),   # acc  = S^T S - T^T T
            pltpu.VMEM((1, feat), jnp.float32),      # ssum = column sum of source
            pltpu.VMEM((1, feat), jnp.float32),      # tsum = column sum of target
        ],
        compiler_params=pltpu.CompilerParams(
            dimension_semantics=("arbitrary",),      # sample axis is a reduction
            vmem_limit_bytes=32 * 1024 * 1024,       # safe on v5e/v6e/v7x
        ),
        cost_estimate=cost,
    )(s0, s1, s2, target)
    return out[0, 0]


def _coral_loss_ref(source, target):
    # pure-JAX reference (faithful translation of the PyTorch module)
    src = jnp.concatenate((source[0], source[1], source[2]), axis=0).astype(jnp.float32)
    tgt = target.astype(jnp.float32)
    xm = jnp.mean(src, axis=0, keepdims=True) - src
    xc = xm.T @ xm
    xmt = jnp.mean(tgt, axis=0, keepdims=True) - tgt
    xct = xmt.T @ xmt
    d = xc - xct
    return jnp.mean(d * d)


if __name__ == "__main__":
    key = jax.random.PRNGKey(0)
    k0, k1, k2, k3 = jax.random.split(key, 4)

    D = 128                      # lane-dense feature dim
    n0, n1, n2 = 64, 64, 56      # unequal chunks; 56 exercises partial-tile masking
    M = 96                       # target samples

    s0 = jax.random.normal(k0, (n0, D), dtype=jnp.float32)
    s1 = jax.random.normal(k1, (n1, D), dtype=jnp.float32)
    s2 = jax.random.normal(k2, (n2, D), dtype=jnp.float32)
    tgt = jax.random.normal(k3, (M, D), dtype=jnp.float32)

    # tile_rows=32 -> 3 grid steps: exercises init/accumulate/finalize + clamped maps
    loss = coral_loss((s0, s1, s2), tgt, tile_rows=32)
    jax.block_until_ready(loss)

    ref = _coral_loss_ref((s0, s1, s2), tgt)
    assert jnp.allclose(loss, ref, rtol=1e-4, atol=1e-4), (loss, ref)

    print("KERNEL_OK")
</pallas_src>

<mosaic_0001>
module attributes {stable_mosaic.version = 11 : i64} {
  func.func @_coral_kernel(%arg0: i32, %arg1: memref<32x128xf32, #tpu.memory_space<vmem>>, %arg2: memref<32x128xf32, #tpu.memory_space<vmem>>, %arg3: memref<32x128xf32, #tpu.memory_space<vmem>>, %arg4: memref<32x128xf32, #tpu.memory_space<vmem>>, %arg5: memref<1x1xf32, #tpu.memory_space<vmem>>, %arg6: memref<128x128xf32, #tpu.memory_space<vmem>>, %arg7: memref<1x128xf32, #tpu.memory_space<vmem>>, %arg8: memref<1x128xf32, #tpu.memory_space<vmem>>) attributes {dimension_semantics = [#tpu.dimension_semantics<arbitrary>], iteration_bounds = array<i64: 3>, scalar_prefetch = 0 : i64, scratch_operands = 3 : i64, tpu.core_type = #tpu.core_type<tc>, window_params = [{transform_indices = @transform_0, window_bounds = array<i64: 32, 128>}, {transform_indices = @transform_1, window_bounds = array<i64: 32, 128>}, {transform_indices = @transform_2, window_bounds = array<i64: 32, 128>}, {transform_indices = @transform_3, window_bounds = array<i64: 32, 128>}, {pipeline_mode = #tpu.pipeline_mode<synchronous>, transform_indices = @transform_4, window_bounds = array<i64: 1, 1>}]} {
    %c0_i32 = arith.constant 0 : i32
    %0 = arith.cmpi eq, %arg0, %c0_i32 : i32
    %1 = arith.extui %0 : i1 to i32
    %c0_i32_0 = arith.constant 0 : i32
    %2 = arith.cmpi ne, %1, %c0_i32_0 : i32
    scf.if %2 {
      %cst = arith.constant 0.000000e+00 : f32
      %18 = vector.broadcast %cst : f32 to vector<128x128xf32>
      %c0 = arith.constant 0 : index
      %c0_9 = arith.constant 0 : index
      %19 = vector.load %arg6[%c0, %c0_9] : memref<128x128xf32, #tpu.memory_space<vmem>>, vector<128x128xf32>
      tpu.vector_store %arg6[%c0, %c0_9], %18 {strides = array<i32>} : memref<128x128xf32, #tpu.memory_space<vmem>>, vector<128x128xf32>,
      %cst_10 = arith.constant 0.000000e+00 : f32
      %20 = vector.broadcast %cst_10 : f32 to vector<1x128xf32>
      %c0_11 = arith.constant 0 : index
      %c0_12 = arith.constant 0 : index
      %21 = vector.load %arg7[%c0_11, %c0_12] : memref<1x128xf32, #tpu.memory_space<vmem>>, vector<1x128xf32>
      tpu.vector_store %arg7[%c0_11, %c0_12], %20 {strides = array<i32>} : memref<1x128xf32, #tpu.memory_space<vmem>>, vector<1x128xf32>,
      %cst_13 = arith.constant 0.000000e+00 : f32
      %22 = vector.broadcast %cst_13 : f32 to vector<1x128xf32>
      %c0_14 = arith.constant 0 : index
      %c0_15 = arith.constant 0 : index
      %23 = vector.load %arg8[%c0_14, %c0_15] : memref<1x128xf32, #tpu.memory_space<vmem>>, vector<1x128xf32>
      tpu.vector_store %arg8[%c0_14, %c0_15], %22 {strides = array<i32>} : memref<1x128xf32, #tpu.memory_space<vmem>>, vector<1x128xf32>,
    } else {
    }
    %c2_i32 = arith.constant 2 : i32
    %3 = arith.cmpi slt, %arg0, %c2_i32 : i32
    %4 = arith.extui %3 : i1 to i32
    %c0_i32_1 = arith.constant 0 : i32
    %5 = arith.cmpi ne, %4, %c0_i32_1 : i32
    scf.if %5 {
      %c0 = arith.constant 0 : index
      %c0_9 = arith.constant 0 : index
      %18 = vector.load %arg1[%c0, %c0_9] : memref<32x128xf32, #tpu.memory_space<vmem>>, vector<32x128xf32>
      %cst = arith.constant dense<0.000000e+00> : vector<128x128xf32>
      %19 = tpu.matmul %18, %18, %cst {dimension_numbers = #tpu.dot_dimension_numbers<[0], [0], [1], [1], [0, 1, 1, 1], [], []>} : vector<32x128xf32>, vector<32x128xf32>, vector<128x128xf32> -> vector<128x128xf32>
      %c0_10 = arith.constant 0 : index
      %c0_11 = arith.constant 0 : index
      %20 = vector.load %arg6[%c0_10, %c0_11] : memref<128x128xf32, #tpu.memory_space<vmem>>, vector<128x128xf32>
      %21 = arith.addf %20, %19 : vector<128x128xf32>
      %c0_12 = arith.constant 0 : index
      %c0_13 = arith.constant 0 : index
      %22 = vector.load %arg6[%c0_12, %c0_13] : memref<128x128xf32, #tpu.memory_space<vmem>>, vector<128x128xf32>
      tpu.vector_store %arg6[%c0_12, %c0_13], %21 {strides = array<i32>} : memref<128x128xf32, #tpu.memory_space<vmem>>, vector<128x128xf32>,
      %c0_14 = arith.constant 0 : index
      %c0_15 = arith.constant 0 : index
      %23 = vector.load %arg7[%c0_14, %c0_15] : memref<1x128xf32, #tpu.memory_space<vmem>>, vector<1x128xf32>
      %cst_16 = arith.constant dense<0.000000e+00> : vector<128xf32>
      %24 = vector.multi_reduction <add>, %18, %cst_16 [0] : vector<32x128xf32> to vector<128xf32>
      %25 = vector.shape_cast %24 : vector<128xf32> to vector<1x128xf32>
      %26 = arith.addf %23, %25 : vector<1x128xf32>
      %c0_17 = arith.constant 0 : index
      %c0_18 = arith.constant 0 : index
      %27 = vector.load %arg7[%c0_17, %c0_18] : memref<1x128xf32, #tpu.memory_space<vmem>>, vector<1x128xf32>
      tpu.vector_store %arg7[%c0_17, %c0_18], %26 {strides = array<i32>} : memref<1x128xf32, #tpu.memory_space<vmem>>, vector<1x128xf32>,
    } else {
    }
    %c2_i32_2 = arith.constant 2 : i32
    %6 = arith.cmpi slt, %arg0, %c2_i32_2 : i32
    %7 = arith.extui %6 : i1 to i32
    %c0_i32_3 = arith.constant 0 : i32
    %8 = arith.cmpi ne, %7, %c0_i32_3 : i32
    scf.if %8 {
      %c0 = arith.constant 0 : index
      %c0_9 = arith.constant 0 : index
      %18 = vector.load %arg2[%c0, %c0_9] : memref<32x128xf32, #tpu.memory_space<vmem>>, vector<32x128xf32>
      %cst = arith.constant dense<0.000000e+00> : vector<128x128xf32>
      %19 = tpu.matmul %18, %18, %cst {dimension_numbers = #tpu.dot_dimension_numbers<[0], [0], [1], [1], [0, 1, 1, 1], [], []>} : vector<32x128xf32>, vector<32x128xf32>, vector<128x128xf32> -> vector<128x128xf32>
      %c0_10 = arith.constant 0 : index
      %c0_11 = arith.constant 0 : index
      %20 = vector.load %arg6[%c0_10, %c0_11] : memref<128x128xf32, #tpu.memory_space<vmem>>, vector<128x128xf32>
      %21 = arith.addf %20, %19 : vector<128x128xf32>
      %c0_12 = arith.constant 0 : index
      %c0_13 = arith.constant 0 : index
      %22 = vector.load %arg6[%c0_12, %c0_13] : memref<128x128xf32, #tpu.memory_space<vmem>>, vector<128x128xf32>
      tpu.vector_store %arg6[%c0_12, %c0_13], %21 {strides = array<i32>} : memref<128x128xf32, #tpu.memory_space<vmem>>, vector<128x128xf32>,
      %c0_14 = arith.constant 0 : index
      %c0_15 = arith.constant 0 : index
      %23 = vector.load %arg7[%c0_14, %c0_15] : memref<1x128xf32, #tpu.memory_space<vmem>>, vector<1x128xf32>
      %cst_16 = arith.constant dense<0.000000e+00> : vector<128xf32>
      %24 = vector.multi_reduction <add>, %18, %cst_16 [0] : vector<32x128xf32> to vector<128xf32>
      %25 = vector.shape_cast %24 : vector<128xf32> to vector<1x128xf32>
      %26 = arith.addf %23, %25 : vector<1x128xf32>
      %c0_17 = arith.constant 0 : index
      %c0_18 = arith.constant 0 : index
      %27 = vector.load %arg7[%c0_17, %c0_18] : memref<1x128xf32, #tpu.memory_space<vmem>>, vector<1x128xf32>
      tpu.vector_store %arg7[%c0_17, %c0_18], %26 {strides = array<i32>} : memref<1x128xf32, #tpu.memory_space<vmem>>, vector<1x128xf32>,
    } else {
    }
    %c2_i32_4 = arith.constant 2 : i32
    %9 = arith.cmpi slt, %arg0, %c2_i32_4 : i32
    %10 = arith.extui %9 : i1 to i32
    %c0_i32_5 = arith.constant 0 : i32
    %11 = arith.cmpi ne, %10, %c0_i32_5 : i32
    scf.if %11 {
      %c0 = arith.constant 0 : index
      %c0_9 = arith.constant 0 : index
      %18 = vector.load %arg3[%c0, %c0_9] : memref<32x128xf32, #tpu.memory_space<vmem>>, vector<32x128xf32>
      %19 = tpu.iota {dimensions = array<i32: 0>} : vector<32x128xi32>
      %c32_i32 = arith.constant 32 : i32
      %20 = arith.muli %arg0, %c32_i32 : i32
      %c56_i32 = arith.constant 56 : i32
      %21 = arith.subi %c56_i32, %20 : i32
      %22 = vector.broadcast %21 : i32 to vector<32x128xi32>
      %23 = arith.cmpi slt, %19, %22 : vector<32x128xi32>
      %cst = arith.constant 0.000000e+00 : f32
      %24 = vector.broadcast %cst : f32 to vector<32x128xf32>
      %25 = arith.select %23, %18, %24 : vector<32x128xi1>, vector<32x128xf32>
      %cst_10 = arith.constant dense<0.000000e+00> : vector<128x128xf32>
      %26 = tpu.matmul %25, %25, %cst_10 {dimension_numbers = #tpu.dot_dimension_numbers<[0], [0], [1], [1], [0, 1, 1, 1], [], []>} : vector<32x128xf32>, vector<32x128xf32>, vector<128x128xf32> -> vector<128x128xf32>
      %c0_11 = arith.constant 0 : index
      %c0_12 = arith.constant 0 : index
      %27 = vector.load %arg6[%c0_11, %c0_12] : memref<128x128xf32, #tpu.memory_space<vmem>>, vector<128x128xf32>
      %28 = arith.addf %27, %26 : vector<128x128xf32>
      %c0_13 = arith.constant 0 : index
      %c0_14 = arith.constant 0 : index
      %29 = vector.load %arg6[%c0_13, %c0_14] : memref<128x128xf32, #tpu.memory_space<vmem>>, vector<128x128xf32>
      tpu.vector_store %arg6[%c0_13, %c0_14], %28 {strides = array<i32>} : memref<128x128xf32, #tpu.memory_space<vmem>>, vector<128x128xf32>,
      %c0_15 = arith.constant 0 : index
      %c0_16 = arith.constant 0 : index
      %30 = vector.load %arg7[%c0_15, %c0_16] : memref<1x128xf32, #tpu.memory_space<vmem>>, vector<1x128xf32>
      %cst_17 = arith.constant dense<0.000000e+00> : vector<128xf32>
      %31 = vector.multi_reduction <add>, %25, %cst_17 [0] : vector<32x128xf32> to vector<128xf32>
      %32 = vector.shape_cast %31 : vector<128xf32> to vector<1x128xf32>
      %33 = arith.addf %30, %32 : vector<1x128xf32>
      %c0_18 = arith.constant 0 : index
      %c0_19 = arith.constant 0 : index
      %34 = vector.load %arg7[%c0_18, %c0_19] : memref<1x128xf32, #tpu.memory_space<vmem>>, vector<1x128xf32>
      tpu.vector_store %arg7[%c0_18, %c0_19], %33 {strides = array<i32>} : memref<1x128xf32, #tpu.memory_space<vmem>>, vector<1x128xf32>,
    } else {
    }
    %c3_i32 = arith.constant 3 : i32
    %12 = arith.cmpi slt, %arg0, %c3_i32 : i32
    %13 = arith.extui %12 : i1 to i32
    %c0_i32_6 = arith.constant 0 : i32
    %14 = arith.cmpi ne, %13, %c0_i32_6 : i32
    scf.if %14 {
      %c0 = arith.constant 0 : index
      %c0_9 = arith.constant 0 : index
      %18 = vector.load %arg4[%c0, %c0_9] : memref<32x128xf32, #tpu.memory_space<vmem>>, vector<32x128xf32>
      %cst = arith.constant dense<0.000000e+00> : vector<128x128xf32>
      %19 = tpu.matmul %18, %18, %cst {dimension_numbers = #tpu.dot_dimension_numbers<[0], [0], [1], [1], [0, 1, 1, 1], [], []>} : vector<32x128xf32>, vector<32x128xf32>, vector<128x128xf32> -> vector<128x128xf32>
      %c0_10 = arith.constant 0 : index
      %c0_11 = arith.constant 0 : index
      %20 = vector.load %arg6[%c0_10, %c0_11] : memref<128x128xf32, #tpu.memory_space<vmem>>, vector<128x128xf32>
      %21 = arith.subf %20, %19 : vector<128x128xf32>
      %c0_12 = arith.constant 0 : index
      %c0_13 = arith.constant 0 : index
      %22 = vector.load %arg6[%c0_12, %c0_13] : memref<128x128xf32, #tpu.memory_space<vmem>>, vector<128x128xf32>
      tpu.vector_store %arg6[%c0_12, %c0_13], %21 {strides = array<i32>} : memref<128x128xf32, #tpu.memory_space<vmem>>, vector<128x128xf32>,
      %c0_14 = arith.constant 0 : index
      %c0_15 = arith.constant 0 : index
      %23 = vector.load %arg8[%c0_14, %c0_15] : memref<1x128xf32, #tpu.memory_space<vmem>>, vector<1x128xf32>
      %cst_16 = arith.constant dense<0.000000e+00> : vector<128xf32>
      %24 = vector.multi_reduction <add>, %18, %cst_16 [0] : vector<32x128xf32> to vector<128xf32>
      %25 = vector.shape_cast %24 : vector<128xf32> to vector<1x128xf32>
      %26 = arith.addf %23, %25 : vector<1x128xf32>
      %c0_17 = arith.constant 0 : index
      %c0_18 = arith.constant 0 : index
      %27 = vector.load %arg8[%c0_17, %c0_18] : memref<1x128xf32, #tpu.memory_space<vmem>>, vector<1x128xf32>
      tpu.vector_store %arg8[%c0_17, %c0_18], %26 {strides = array<i32>} : memref<1x128xf32, #tpu.memory_space<vmem>>, vector<1x128xf32>,
    } else {
    }
    %c2_i32_7 = arith.constant 2 : i32
    %15 = arith.cmpi eq, %arg0, %c2_i32_7 : i32
    %16 = arith.extui %15 : i1 to i32
    %c0_i32_8 = arith.constant 0 : i32
    %17 = arith.cmpi ne, %16, %c0_i32_8 : i32
    scf.if %17 {
      %c0 = arith.constant 0 : index
      %c0_9 = arith.constant 0 : index
      %18 = vector.load %arg7[%c0, %c0_9] : memref<1x128xf32, #tpu.memory_space<vmem>>, vector<1x128xf32>
      %cst = arith.constant 0.00543478271 : f32
      %19 = vector.broadcast %cst : f32 to vector<1x128xf32>
      %20 = arith.mulf %18, %19 : vector<1x128xf32>
      %c0_10 = arith.constant 0 : index
      %c0_11 = arith.constant 0 : index
      %21 = vector.load %arg8[%c0_10, %c0_11] : memref<1x128xf32, #tpu.memory_space<vmem>>, vector<1x128xf32>
      %cst_12 = arith.constant 0.010416667 : f32
      %22 = vector.broadcast %cst_12 : f32 to vector<1x128xf32>
      %23 = arith.mulf %21, %22 : vector<1x128xf32>
      %cst_13 = arith.constant dense<0.000000e+00> : vector<128x128xf32>
      %24 = tpu.matmul %20, %20, %cst_13 {dimension_numbers = #tpu.dot_dimension_numbers<[0], [0], [1], [1], [0, 1, 1, 1], [], []>} : vector<1x128xf32>, vector<1x128xf32>, vector<128x128xf32> -> vector<128x128xf32>
      %cst_14 = arith.constant dense<0.000000e+00> : vector<128x128xf32>
      %25 = tpu.matmul %23, %23, %cst_14 {dimension_numbers = #tpu.dot_dimension_numbers<[0], [0], [1], [1], [0, 1, 1, 1], [], []>} : vector<1x128xf32>, vector<1x128xf32>, vector<128x128xf32> -> vector<128x128xf32>
      %c0_15 = arith.constant 0 : index
      %c0_16 = arith.constant 0 : index
      %26 = vector.load %arg6[%c0_15, %c0_16] : memref<128x128xf32, #tpu.memory_space<vmem>>, vector<128x128xf32>
      %cst_17 = arith.constant 1.840000e+02 : f32
      %27 = vector.broadcast %cst_17 : f32 to vector<128x128xf32>
      %28 = arith.mulf %27, %24 : vector<128x128xf32>
      %29 = arith.subf %26, %28 : vector<128x128xf32>
      %cst_18 = arith.constant 9.600000e+01 : f32
      %30 = vector.broadcast %cst_18 : f32 to vector<128x128xf32>
      %31 = arith.mulf %30, %25 : vector<128x128xf32>
      %32 = arith.addf %29, %31 : vector<128x128xf32>
      %33 = arith.mulf %32, %32 : vector<128x128xf32>
      %34 = vector.shape_cast %33 : vector<128x128xf32> to vector<1x128x128xf32>
      %cst_19 = arith.constant dense<0.000000e+00> : vector<1xf32>
      %35 = vector.multi_reduction <add>, %34, %cst_19 [1, 2] : vector<1x128x128xf32> to vector<1xf32>
      %36 = vector.shape_cast %35 : vector<1xf32> to vector<1x1x1xf32>
      %37 = vector.extract %36[0, 0, 0] : f32 from vector<1x1x1xf32>
      %cst_20 = arith.constant 1.638400e+04 : f32
      %38 = arith.divf %37, %cst_20 : f32
      %39 = vector.broadcast %38 : f32 to vector<1x1xf32>
      %c0_21 = arith.constant 0 : index
      %c0_22 = arith.constant 0 : index
      %40 = vector.load %arg5[%c0_21, %c0_22] : memref<1x1xf32, #tpu.memory_space<vmem>>, vector<1x1xf32>
      tpu.vector_store %arg5[%c0_21, %c0_22], %39 {strides = array<i32>} : memref<1x1xf32, #tpu.memory_space<vmem>>, vector<1x1xf32>,
    } else {
    }
    return
  }
  func.func @transform_0(%arg0: i32) -> (i32, i32) {
    %c1_i32 = arith.constant 1 : i32
    %0 = arith.minsi %arg0, %c1_i32 : i32
    %c0_i32 = arith.constant 0 : i32
    %c0_i32_0 = arith.constant 0 : i32
    return %0, %c0_i32 : i32, i32
  }
  func.func @transform_1(%arg0: i32) -> (i32, i32) {
    %c1_i32 = arith.constant 1 : i32
    %0 = arith.minsi %arg0, %c1_i32 : i32
    %c0_i32 = arith.constant 0 : i32
    %c0_i32_0 = arith.constant 0 : i32
    return %0, %c0_i32 : i32, i32
  }
  func.func @transform_2(%arg0: i32) -> (i32, i32) {
    %c1_i32 = arith.constant 1 : i32
    %0 = arith.minsi %arg0, %c1_i32 : i32
    %c0_i32 = arith.constant 0 : i32
    %c0_i32_0 = arith.constant 0 : i32
    return %0, %c0_i32 : i32, i32
  }
  func.func @transform_3(%arg0: i32) -> (i32, i32) {
    %c2_i32 = arith.constant 2 : i32
    %0 = arith.minsi %arg0, %c2_i32 : i32
    %c0_i32 = arith.constant 0 : i32
    %c0_i32_0 = arith.constant 0 : i32
    return %0, %c0_i32 : i32, i32
  }
  func.func @transform_4(%arg0: i32) -> (i32, i32) {
    %c0_i32 = arith.constant 0 : i32
    %c0_i32_0 = arith.constant 0 : i32
    %c0_i32_1 = arith.constant 0 : i32
    return %c0_i32, %c0_i32_0 : i32, i32
  }
}

</mosaic_0001>

<bundles_post_ra>
// kernel: tpu_custom_call.1
= control target key start
LH: loop header
LB: loop body
LE: loop exit
PB: predicated region body
PF: predicated region fallthrough
CT: control target
= control target key end

     0   :  { %s2825_s0 = inlined_call_operand.hbm [shape: f32[64,128], index: 0, kind: input, shape index: {}]   ;;  %s2826_s1 = inlined_call_operand.hbm [shape: f32[64,128], index: 1, kind: input, shape index: {}]   ;;  %s2827_s2 = inlined_call_operand.hbm [shape: f32[56,128], index: 2, kind: input, shape index: {}]   ;;  %s2828_s3 = inlined_call_operand.hbm [shape: f32[96,128], index: 3, kind: input, shape index: {}]   ;;  %s2829_s4 = inlined_call_operand.hbm [shape: f32[1,1], index: 4, kind: output, shape index: {}]  }
   0x1   :  { %2833 = sst [smem:[#allocation22_spill]] %s2825_s0 }
   0x2   :  { %2834 = sst [smem:[#allocation23_spill]] %s2829_s4 }
   0x3   :  { %9 = vsyncpa [#allocation6], 0 }
   0x4   :  { %11 = vsyncpa [#allocation6 + $0x1], 0 }
   0x5   :  { %12 = vsyncpa [#allocation9], 0 }
   0x6   :  { %14 = vsyncpa [#allocation9 + $0x1], 0 }
   0x7   :  { %15 = vsyncpa [#allocation12], 0 }
   0x8   :  { %17 = vsyncpa [#allocation12 + $0x1], 0 }
   0x9   :  { %18 = vsyncpa [#allocation7], 0  ;;  %s2329_s15 = smov 0   ;;  %s2331_s16 = smov 0  }
   0xa   :  { %s2333_s17 = smov 0   ;;  %s2335_s18 = smov 0  }
   0xb   :  { %s2337_s19 = smov 0   ;;  %s2339_s20 = smov 0  }
   0xc   :  { %s2341_s21 = smov 0  }
   0xd LB: > { %2835 = sst [smem:[#allocation18_spill]] %s2290_s20  ;;  %s2363_s22 = sadd.s32 4294967295, %s2294_s21   ;;  %s2294_s21 = sphi %s2341_s21, %s2846_s21   ;;  %s2290_s20 = sphi %s2339_s20, %s2855_s20   ;;  %s2286_s19 = sphi %s2337_s19, %s2854_s19   ;;  %s2282_s18 = sphi %s2335_s18, %s2853_s18   ;;  %s2278_s17 = sphi %s2333_s17, %s2852_s17   ;;  %s2274_s16 = sphi %s2331_s16, %s2851_s16   ;;  %s2270_s15 = sphi %s2329_s15, %s2850_s15  }
   0xe   : > { %s2366_s23 = sadd.s32 1, %s2294_s21   ;;  %p28_p0 = scmp.lt.s32.totalorder %s2294_s21, 1 }
   0xf   : > { %2836 = sst [smem:[#allocation19_spill]] %s2366_s23  ;;  %p30_p1 = scmp.lt.s32.totalorder %s2366_s23, 1 }
  0x10   : > { %s35_s24 = sadd.s32 1, %s2290_s20  ;;  %p42_p2 = scmp.ne.s32.totalorder %s2290_s20, %s2286_s19 }
  0x11   : > { %s2374_s25 = scalar_select %p28_p0, %s2294_s21, 1 }
  0x12   : > { %s31_s26 = scalar_select %p30_p1, %s2366_s23, 1 }
  0x13   : > { %p43_p3 = scmp.eq.s32.totalorder %s2294_s21, 0  ;;  %p48_p4 = scmp.ne.s32.totalorder %s2286_s19, %s2282_s18 }
  0x14   : > { %s32_s27 = ssub.s32 %s2374_s25, %s31_s26  ;;  %p49_p5 = scmp.eq.s32.totalorder %s2363_s22, 0 }
  0x15   : > { %p33_p6 = scmp.eq.s32.totalorder %s32_s27, 0  ;;  %p2383_p7 = por %p43_p3, %p42_p2 }
  0x16   : > { %p2387_p8 = por %p49_p5, %p48_p4  ;;  %p118_p9 = scmp.lt.s32.totalorder %s2294_s21, 2 }
  0x17   : > { %s2393_s30 = scalar_select %p33_p6, %s2290_s20, %s35_s24  }
  0x18   : > { %s2396_s5 = scalar_select %p118_p9, %s2294_s21, 2 }
  0x19   : > { %2839 = sst [smem:[#allocation20_spill]] %s2393_s30  ;;  %p120_p10 = scmp.lt.s32.totalorder %s2366_s23, 2 }
  0x1a   : > { %p132_p11 = scmp.ne.s32.totalorder %s2278_s17, %s2274_s16  ;;  %p138_p12 = scmp.ne.s32.totalorder %s2274_s16, %s2270_s15 }
  0x1b   : > { %s121_s6 = scalar_select %p120_p10, %s2366_s23, 2 }
  0x1c   : > { %p2406_p13 = por %p132_p11, %p43_p3  ;;  %p2410_p0 = por %p138_p12, %p49_p5 }
  0x1d   : > { %s122_s9 = ssub.s32 %s2396_s5, %s121_s6  ;;  %s125_s10 = sadd.s32 1, %s2278_s17 }
  0x1e   : > { %p123_p1 = scmp.eq.s32.totalorder %s122_s9, 0  ;;  %p1825_p2 = scmp.ge.s32.totalorder %s2294_s21, 3 }
  0x1f   : > { %s183_s12 = sand.u32 (!%p1825_p2), 1, %s2290_s20   ;;  %s2422_s13 = sshll.u32 (!%p1825_p2), %s2374_s25, 5 }
  0x20   : > { %s2417_s11 = scalar_select %p123_p1, %s2278_s17, %s125_s10  }
  0x21   : > { %179 = sbr.rel (%p1825_p2) target bundleno = 123 (0x7b), region = 16  ;;  %s2424_s14 = sshll.u32 (!%p1825_p2), %s183_s12, 5 }
  0x22   : > { %2842 = sst [smem:[#allocation21_spill]] %s2417_s11  ;;  %s187_s27 = scalar_lea.vmem (!%p1825_p2), [#allocation5], %s2424_s14 }
  0x23   : > { %s2843_s0 = sld [smem:[#allocation22_spill]] (!%p1825_p2)  ;;  %s197_s6 = sshll.u32 (!%p1825_p2), %s187_s27, 4  ;;  %s198_s6 = int_to_ptr.vmem [resolvable:$true] %s197_s6 }
  0x24   : > { %s184_s9 = scalar_lea.sflag (!%p1825_p2), [#allocation6], %s183_s12 }
  0x29   : > { %s194_s24 = scalar_lea.hbm %s2843_s0, %s2422_s13  ;;  %s2079_s23 = scalar_lea.hbm %s2843_s0, 64 }
  0x2a   : > { %s195_s26 = sshll.u32 %s194_s24, 4  ;;  %s196_s26 = int_to_ptr.hbm [resolvable:$true] %s195_s26 }
  0x2b   : > { %s2073_s10 = sshra.s32 %s196_s26, 4  ;;  %s2074_s10 = int_to_ptr.hbm [resolvable:$true] %s2073_s10 }
  0x2c   : > { %s2075_s30 = scalar_lea.hbm %s2074_s10, 32  ;;  %p2080_p6 = scmp.lt.s32.totalorder %s2074_s10, %s2843_s0 }
  0x2d   : > { %p2076_p3 = scmp.ne.s32.totalorder %s2074_s10, %s2075_s30  ;;  %p2081_p9 = scmp.lt.s32.totalorder %s2079_s23, %s2075_s30 }
  0x2f   : > { %p2077_p4 = pnand %p2076_p3, %p2383_p7  ;;  %p2082_p10 = por %p2081_p9, %p2080_p6 }
  0x31   : > { %p2078_p5 = pneg %p2077_p4 }
  0x33   : > { %p2083_p11 = pnand %p2082_p10, %p2078_p5 }
  0x35   : > { %2086 = shalt.err (!%p2083_p11)
}
  0x36   : > { %s2296_s12 = smov 128   ;;  %s2297_s24 = smov 8  }
  0x37   : > { %1992 = dma.hbm_to_vmem [thread:$0]  (%p2383_p7), %s196_s26, 512, %s198_s6, %s184_s9, %s2296_s12, %s2296_s12, %s2297_s24  }
  0x38   : > { %s207_s20 = sand.u32 1, %s2294_s21   ;;  %s218_s23 = scalar_lea.hbm %s2826_s1, %s2422_s13 }
  0x39   : > { %s219_s30 = sshll.u32 %s218_s23, 4  ;;  %s211_s10 = scalar_lea.vmem [#allocation8], %s2424_s14  ;;  %s220_s30 = int_to_ptr.hbm [resolvable:$true] %s219_s30 }
  0x3a   : > { %s221_s15 = sshll.u32 %s211_s10, 4  ;;  %s2450_s18 = scalar_lea.sflag [#allocation9], %s207_s20  ;;  %s222_s15 = int_to_ptr.vmem [resolvable:$true] %s221_s15 }
  0x3b   : > { %s2101_s0 = sshra.s32 %s220_s30, 4  ;;  %s2107_s9 = scalar_lea.hbm %s2826_s1, 64  ;;  %s2102_s0 = int_to_ptr.hbm [resolvable:$true] %s2101_s0 }
  0x3c   : > { %s2103_s4 = scalar_lea.hbm %s2102_s0, 32  ;;  %p2108_p3 = scmp.lt.s32.totalorder %s2102_s0, %s2826_s1 }
  0x3d   : > { %p2104_p12 = scmp.ne.s32.totalorder %s2102_s0, %s2103_s4  ;;  %p2109_p4 = scmp.lt.s32.totalorder %s2107_s9, %s2103_s4 }
  0x3f   : > { %p2105_p1 = pnand %p2104_p12, %p2383_p7  ;;  %p2110_p5 = por %p2109_p4, %p2108_p3 }
  0x41   : > { %p2106_p2 = pneg %p2105_p1 }
  0x43   : > { %p2111_p6 = pnand %p2110_p5, %p2106_p2 }
  0x45   : > { %2114 = shalt.err (!%p2111_p6)
}
  0x46   : > { %1993 = dma.hbm_to_vmem [thread:$0]  (%p2383_p7), %s220_s30, 512, %s222_s15, %s2450_s18, %s2296_s12, %s2296_s12, %s2297_s24  }
  0x47   : > { %230 = sbr.rel (!%p2383_p7) target bundleno = 107 (0x6b), region = 28  ;;  %s1833_s20 = sshll.u32 (%p2383_p7), %s2374_s25, 2 }
  0x48   : > { %s239_s23 = ssub.s32 (%p2383_p7), 7, %s1833_s20  ;;  %s235_s26 = scalar_lea.vmem (%p2383_p7), [#allocation10], %s2424_s14 }
  0x49   : > { %p240_p9 = scmp.lt.s32.totalorder (%p2383_p7), %s239_s23, 4 }
  0x4c   : > { %s2857_s23 = smov (!%p240_p9, %s239_s23), 4 }
  0x4d   : > { %s1834_s0 = sshll.u32 %s2857_s23, 3 }
  0x4e   : > { %s243_s4 = ssub.s32 32, %s1834_s0 }
  0x4f   : > { %s244_s10 = sshll.u32 %s243_s4, 4 }
  0x50   : > { %245 = vsyncadd %s2450_s18, %s244_s10  ;;  %p2474_p10 = scmp.ne.s32.totalorder %s1834_s0, 0  ;;  %s248_s25 = scalar_lea.hbm %s2827_s2, %s2422_s13 }
  0x51   : > { %s2482_s6 = sshll.u32 %s248_s25, 4  ;;  %s2484_s9 = sshll.u32 %s235_s26, 4  ;;  %s251_s6 = int_to_ptr.hbm [resolvable:$true] %s2482_s6  ;;  %s253_s9 = int_to_ptr.vmem [resolvable:$true] %s2484_s9 }
  0x52   : > { %s1838_s14 = sshll.u32 %s2857_s23, 7  ;;  %s2129_s11 = sshra.s32 %s251_s6, 4  ;;  %s2130_s11 = int_to_ptr.hbm [resolvable:$true] %s2129_s11 }
  0x53   : > { %s2131_s27 = sshrl.u32 %s1838_s14, 4  ;;  %s2140_s4 = scalar_lea.hbm %s2827_s2, 56 }
  0x54   : > { %s2136_s20 = scalar_lea.hbm %s2130_s11, %s2131_s27  ;;  %p2141_p1 = scmp.lt.s32.totalorder %s2130_s11, %s2827_s2 }
  0x55   : > { %p2137_p7 = scmp.ne.s32.totalorder %s2130_s11, %s2136_s20  ;;  %p2142_p2 = scmp.lt.s32.totalorder %s2140_s4, %s2136_s20 }
  0x57   : > { %p2138_p11 = pnand %p2137_p7, %p2474_p10  ;;  %p2143_p3 = por %p2142_p2, %p2141_p1 }
  0x59   : > { %p2139_p12 = pneg %p2138_p11 }
  0x5b   : > { %p2144_p4 = pnand %p2143_p3, %p2139_p12 }
  0x5d   : > { %2147 = shalt.err (!%p2144_p4)
}
  0x5e   : > { %s2148_s30 = sshra.s32 %s253_s9, 4  ;;  %s2298_s25 = smov [#allocation10]   ;;  %s2149_s30 = int_to_ptr.vmem [resolvable:$true] %s2148_s30 }
  0x5f   : > { %s2155_s15 = scalar_lea.vmem %s2149_s30, %s2131_s27  ;;  %s2159_s13 = scalar_lea.vmem %s2298_s25, 64 }
  0x60   : > { %p2156_p5 = scmp.ne.s32.totalorder %s2149_s30, %s2155_s15  ;;  %p2161_p7 = scmp.lt.s32.totalorder %s2159_s13, %s2155_s15 }
  0x62   : > { %p2157_p6 = pnand %p2156_p5, %p2474_p10 }
  0x64   : > { %p2158_p9 = pneg %p2157_p6 }
  0x66   : > { %p2163_p11 = pnand %p2161_p7, %p2158_p9 }
  0x68   : > { %2166 = shalt.err (!%p2163_p11)
}
  0x69   : > { %s2299_s11 = smov 128   ;;  %s2300_s20 = smov 8  }
  0x6a   : > { %258 = dma.hbm_to_vmem [thread:$0]  (%p2474_p10), %s251_s6, %s1838_s14, %s253_s9, %s2450_s18, %s2299_s11, %s2299_s11, %s2300_s20  }
  0x6b PF: > { %s262_s27 = sand.u32 1, %s2278_s17   ;;  %s1961_s0 = sshll.u32 %s2396_s5, 5 }
  0x6c   : > { %s1839_s4 = sshll.u32 %s262_s27, 5  ;;  %s273_s30 = scalar_lea.hbm %s2828_s3, %s1961_s0 }
  0x6d   : > { %s274_s15 = sshll.u32 %s273_s30, 4  ;;  %s266_s25 = scalar_lea.vmem [#allocation11], %s1839_s4  ;;  %s275_s15 = int_to_ptr.hbm [resolvable:$true] %s274_s15 }
  0x6e   : > { %s276_s13 = sshll.u32 %s266_s25, 4  ;;  %s263_s28 = scalar_lea.sflag [#allocation12], %s262_s27  ;;  %s277_s13 = int_to_ptr.vmem [resolvable:$true] %s276_s13 }
  0x6f   : > { %s2168_s23 = sshra.s32 %s275_s15, 4  ;;  %s2174_s9 = scalar_lea.hbm %s2828_s3, 96  ;;  %s2169_s23 = int_to_ptr.hbm [resolvable:$true] %s2168_s23 }
  0x70   : > { %s2170_s18 = scalar_lea.hbm %s2169_s23, 32  ;;  %p2175_p2 = scmp.lt.s32.totalorder %s2169_s23, %s2828_s3 }
  0x71   : > { %p2171_p10 = scmp.ne.s32.totalorder %s2169_s23, %s2170_s18  ;;  %p2176_p3 = scmp.lt.s32.totalorder %s2174_s9, %s2170_s18 }
  0x73   : > { %p2172_p12 = pnand %p2171_p10, %p2406_p13  ;;  %p2177_p4 = por %p2176_p3, %p2175_p2 }
  0x75   : > { %p2173_p1 = pneg %p2172_p12 }
  0x77   : > { %p2178_p5 = pnand %p2177_p4, %p2173_p1 }
  0x79   : > { %2181 = shalt.err (!%p2178_p5)
}
  0x7a   : > { %1994 = dma.hbm_to_vmem [thread:$0]  (%p2406_p13), %s275_s15, 512, %s277_s13, %s263_s28, %s2296_s12, %s2296_s12, %s2297_s24  }
  0x7b PF: > { %p1842_p6 = scmp.ge.s32.totalorder %s2294_s21, 1  ;;  %p284_p9 = scmp.lt.s32.totalorder %s2294_s21, 4 }
  0x7d   : > { %p285_p7 = pnand %p1842_p6, %p284_p9 }
  0x7e   : > { %s290_s20 = sand.u32 (!%p285_p7), 1, %s2286_s19  }
  0x7f   : > { %288 = sbr.rel (%p285_p7) target bundleno = 1843 (0x733), region = 36  ;;  %s1843_s27 = sshll.u32 (!%p285_p7), %s290_s20, 5 }
  0x80   : > { %s291_s0 = scalar_lea.sflag (!%p285_p7), [#allocation6], %s290_s20  ;;  %s2535_s4 = scalar_lea.vmem (!%p285_p7), [#allocation5], %s1843_s27 }
  0x84   : > { %2253 = dma.done.wait (%p2387_p8), %s291_s0, 512  }
  0x85   : > { %2255 = vsyncadd (%p2387_p8), %s291_s0, 4294966784  ;;  %s300_s7 = sand.u32 1, %s2363_s22   ;;  %s2542_s24 = scalar_lea.vmem [#allocation8], %s1843_s27 }
  0x86   : > { %s301_s12 = scalar_lea.sflag [#allocation9], %s300_s7 }
  0x87   : > { %2257 = dma.done.wait (%p2387_p8), %s301_s12, 1024  }
  0x88   : > { %2259 = vsyncadd (%p2387_p8), %s301_s12, 4294966272  ;;  %s320_s21 = sand.u32 1, %s2274_s16   ;;  %s2549_s26 = scalar_lea.vmem [#allocation10], %s1843_s27 }
  0x89   : > { %s1846_s10 = sshll.u32 %s320_s21, 5  ;;  %s321_s30 = scalar_lea.sflag [#allocation12], %s320_s21 }
  0x8a   : > { %s2551_s15 = scalar_lea.vmem [#allocation11], %s1846_s10 }
  0x8b   : > { %2261 = dma.done.wait (%p2410_p0), %s321_s30, 512  }
  0x8c   : > { %2263 = vsyncadd (%p2410_p0), %s321_s30, 4294966784  ;;  %p1847_p13 = scmp.ne.s32.totalorder %s2363_s22, 0 }
  0x8e   : > { %379 = sbr.rel (%p1847_p13) target bundleno = 166 (0xa6), region = 56 }
  0x93   : > { %v2301_v0 = vmov 0.0  }
  0x94   : > { %380 = vst [vmem:[#allocation2 + $0x30] sm:$0xff] %v2301_v0 }
  0x95   : > { %381 = vst [vmem:[#allocation2] sm:$0xff] %v2301_v0 }
  0x96   : > { %382 = vst [vmem:[#allocation2 + $0x58] sm:$0xff] %v2301_v0 }
  0x97   : > { %383 = vst [vmem:[#allocation2 + $0x18] sm:$0xff] %v2301_v0 }
  0x98   : > { %384 = vst [vmem:[#allocation2 + $0x50] sm:$0xff] %v2301_v0 }
  0x99   : > { %385 = vst [vmem:[#allocation2 + $0x68] sm:$0xff] %v2301_v0 }
  0x9a   : > { %386 = vst [vmem:[#allocation2 + $0x8] sm:$0xff] %v2301_v0 }
  0x9b   : > { %387 = vst [vmem:[#allocation2 + $0x48] sm:$0xff] %v2301_v0 }
  0x9c   : > { %388 = vst [vmem:[#allocation2 + $0x40] sm:$0xff] %v2301_v0 }
  0x9d   : > { %389 = vst [vmem:[#allocation2 + $0x20] sm:$0xff] %v2301_v0 }
  0x9e   : > { %390 = vst [vmem:[#allocation2 + $0x10] sm:$0xff] %v2301_v0 }
  0x9f   : > { %391 = vst [vmem:[#allocation2 + $0x38] sm:$0xff] %v2301_v0 }
  0xa0   : > { %392 = vst [vmem:[#allocation2 + $0x60] sm:$0xff] %v2301_v0 }
  0xa1   : > { %393 = vst [vmem:[#allocation2 + $0x70] sm:$0xff] %v2301_v0 }
  0xa2   : > { %394 = vst [vmem:[#allocation2 + $0x78] sm:$0xff] %v2301_v0 }
  0xa3   : > { %395 = vst [vmem:[#allocation2 + $0x28] sm:$0xff] %v2301_v0 }
  0xa4   : > { %396 = vst [vmem:[#allocation3] sm:$0x1] %v2301_v0 }
  0xa5   : > { %397 = vst [vmem:[#allocation4] sm:$0x1] %v2301_v0 }
  0xa6 PF: > { %p1848_p8 = scmp.ge.s32.totalorder %s2363_s22, 2 }
  0xa7   : > { %s1881_s29 = sshll.u32 (!%p1848_p8), %s2363_s22, 5 }
  0xa8   : > { %401 = sbr.rel (%p1848_p8) target bundleno = 658 (0x292), region = 60  ;;  %s831_s8 = ssub.s32 (!%p1848_p8), 56, %s1881_s29 }
  0xad   : > { %v402_v1 = vld [vmem:[%s2535_s4] sm:$0xff]  ;;  %v403_v2 = vld [vmem:[%s2535_s4 + $0x8] sm:$0xff]  ;;  %v825_v4 = vlaneseq  ;;  %v2570_v7 = vld [vmem:[%s2535_s4 + $0x18] sm:$0xff]  ;;  %v2580_v12 = vstv %s831_s8  ;;  %vm438_vm4 = vcmask 261120  }
  0xae   : > { %v2562_v3 = vld [vmem:[%s2542_s24] sm:$0xff]  ;;  %406 = vxpose.xlu0.b32.start [1/4] (short) %v402_v1, 128  ;;  %v601_v5 = vadd.f32 %v403_v2, %v402_v1  ;;  %v2567_v6 = vld [vmem:[%s2542_s24 + $0x8] sm:$0xff]  ;;  %v404_v8 = vld [vmem:[%s2535_s4 + $0x10] sm:$0xff]  ;;  %499 = vmatpush.msra.mxu0 %v2570_v7 }
  0xaf   : > { %616 = vxpose.xlu1.b32.start [1/4] (short) %v2562_v3, 128  ;;  %v810_v9 = vadd.f32 %v2567_v6, %v2562_v3  ;;  %v2576_v10 = vld [vmem:[%s2549_s26] sm:$0xff]  ;;  %v2578_v11 = vshrl.u32 %v825_v4, 7  ;;  %1962 = vmatpush.msra.mxu3 %v2570_v7  ;;  %v614_v14 = vld [vmem:[%s2542_s24 + $0x10] sm:$0xff]  ;;  %v2586_v15 = vld [vmem:[%s2542_s24 + $0x18] sm:$0xff] }
  0xb0   : > { %v602_v13 = vadd.f32 %v601_v5, %v404_v8  ;;  %v2591_v17 = vld [vmem:[%s2549_s26 + $0x8] sm:$0xff]  ;;  %500 = vmatpush.msra.mxu0 %v404_v8  ;;  %708 = vmatpush.msra.mxu1 %v2586_v15  ;;  %v2612_v24 = vld [vmem:[%s2549_s26 + $0x10] sm:$0xff]  ;;  %v2621_v27 = vld [vmem:[%s2549_s26 + $0x18] sm:$0xff] }
  0xb1   : > { %vm833_vm0 = vcmp.lt.s32.totalorder %v2578_v11, %v2580_v12  ;;  %v811_v16 = vadd.f32 %v810_v9, %v614_v14  ;;  %v2594_v18 = vadd.s32 8, %v2578_v11  ;;  %v2597_v19 = vadd.s32 16, %v2578_v11  ;;  %1963 = vmatpush.msra.mxu3 %v404_v8  ;;  %v600_v41 = vld [vmem:[#allocation3] sm:$0x1] }
  0xb2   : > { %v603_v20 = vadd.f32 %v602_v13, %v2570_v7  ;;  %v837_v21 = vsel %vm833_vm0, %v2576_v10, 0.0  ;;  %v2606_v22 = vadd.s32 24, %v2578_v11  ;;  %501 = vmatpush.msra.mxu0 %v403_v2  ;;  %709 = vmatpush.msra.mxu1 %v614_v14 }
  0xb3   : > { %841 = vxpose.xlu2.b32.start [1/4] (short) %v837_v21, 128  ;;  %vm834_vm1 = vcmp.lt.s32.totalorder %v2594_v18, %v2580_v12  ;;  %v812_v23 = vadd.f32 %v811_v16, %v2586_v15  ;;  %vm835_vm2 = vcmp.lt.s32.totalorder %v2597_v19, %v2580_v12  ;;  %1964 = vmatpush.msra.mxu3 %v403_v2  ;;  %v552_v19 = vld [vmem:[#allocation2 + $0x30] sm:$0xff] }
  0xb4   : > { %v604_v25 = vrot.slane %v603_v20, 4  ;;  %v838_v26 = vsel %vm834_vm1, %v2591_v17, 0.0  ;;  %vm836_vm3 = vcmp.lt.s32.totalorder %v2606_v22, %v2580_v12  ;;  %502 = vmatpush.msra.mxu0 %v402_v1  ;;  %v839_v31 = vsel %vm835_vm2, %v2612_v24, 0.0  ;;  %710 = vmatpush.msra.mxu1 %v2567_v6 }
  0xb5   : > { %v1035_v28 = vadd.f32 %v838_v26, %v837_v21  ;;  %v813_v29 = vrot.slane %v812_v23, 4  ;;  %1882 = vmatpush.msk.msra.mxu2 %vm836_vm3, %v2621_v27  ;;  %v840_v35 = vsel %vm836_vm3, %v2621_v27, 0.0  ;;  %1965 = vmatpush.msra.mxu3 %v402_v1 }
  0xb6   : > { %407 = vxpose.xlu0.b32.cont [2/4] (short) %v403_v2, 128  ;;  %v605_v30 = vadd.f32 %v604_v25, %v603_v20  ;;  %711 = vmatpush.msra.mxu1 %v2562_v3 }
  0xb7   : > { %617 = vxpose.xlu1.b32.cont [2/4] (short) %v2567_v6, 128  ;;  %v814_v32 = vadd.f32 %v813_v29, %v812_v23  ;;  %v1036_v33 = vadd.f32 %v1035_v28, %v839_v31  ;;  %1883 = vmatpush.msk.msra.mxu2 %vm835_vm2, %v2612_v24 }
  0xb8   : > { %v606_v34 = vrot.slane %v605_v30, 2  ;;  %1966 = vmatpush.msrb.mxu3 %v2586_v15 }
  0xb9   : > { %v1037_v36 = vadd.f32 %v1036_v33, %v840_v35  ;;  %1884 = vmatpush.msk.msra.mxu2 %vm834_vm1, %v2591_v17  ;;  %v815_v38 = vrot.slane %v814_v32, 2 }
  0xba   : > { %v607_v37 = vadd.f32 %v606_v34, %v605_v30  ;;  %1967 = vmatpush.msrb.mxu3 %v614_v14 }
  0xbb   : > { %842 = vxpose.xlu2.b32.cont [2/4] (short) %v838_v26, 128  ;;  %1885 = vmatpush.msk.msra.mxu2 %vm833_vm0, %v2576_v10  ;;  %v1038_v40 = vrot.slane %v1037_v36, 4  ;;  %v816_v43 = vadd.f32 %v815_v38, %v814_v32 }
  0xbc   : > { %v608_v39 = vrot.slane %v607_v37, 1  ;;  %1968 = vmatpush.msrb.mxu3 %v2567_v6 }
  0xbd   : > { %v1039_v45 = vadd.f32 %v1038_v40, %v1037_v36  ;;  %v817_v46 = vrot.slane %v816_v43, 1 }
  0xbe   : > { %408 = vxpose.xlu0.b32.cont [3/4] (short) %v404_v8, 128  ;;  %v609_v42 = vadd.f32 %v608_v39, %v607_v37  ;;  %1969 = vmatpush.msrb.mxu3 %v2562_v3 }
  0xbf   : > { %618 = vxpose.xlu1.b32.cont [3/4] (short) %v614_v14, 128  ;;  %v1040_v47 = vrot.slane %v1039_v45, 2  ;;  %v818_v48 = vadd.f32 %v817_v46, %v816_v43 }
  0xc0   : > { %v610_v44 = vadd.f32 %v609_v42, %v600_v41 }
  0xc1   : > { %v1041_v49 = vadd.f32 %v1040_v47, %v1039_v45 }
  0xc2   : > { %611 = vst [vmem:[#allocation3] sm:$0x1] %v610_v44 }
  0xc3   : > { %843 = vxpose.xlu2.b32.cont [3/4] (short) %v839_v31, 128  ;;  %v1042_v52 = vrot.slane %v1041_v49, 1 }
  0xc5   : > { %v1043_v53 = vadd.f32 %v1042_v52, %v1041_v49  ;;  %v554_v49 = vld [vmem:[#allocation2 + $0x58] sm:$0xff] }
  0xc6   : > { %409 = vxpose.xlu0.b32.end [4/4] (short) %v2570_v7, 128 }
  0xc7   : > { %619 = vxpose.xlu1.b32.end [4/4] (short) %v2586_v15, 128 }
  0xc9   : > { %v809_v50 = vld [vmem:[#allocation3] sm:$0x1] }
  0xca   : > { %v819_v51 = vadd.f32 %v818_v48, %v809_v50 }
  0xcb   : > { %844 = vxpose.xlu2.b32.end [4/4] (short) %v840_v35, 128 }
  0xcc   : > { %820 = vst [vmem:[#allocation3] sm:$0x1] %v819_v51 }
  0xd3   : > { %v1034_v54 = vld [vmem:[#allocation3] sm:$0x1] }
  0xd4   : > { %v1044_v55 = vadd.f32 %v1043_v53, %v1034_v54 }
  0xd6   : > { %1045 = vst [vmem:[#allocation3] sm:$0x1] %v1044_v55 }
 0x14c   : > { %v857_v56 = vpop.trf.xlu2 }
 0x14d   : > { %1886 = vmatmul.msk.f32.vlgmr.msra.gmra.mxu2 %vm438_vm4, %v857_v56  ;;  %v555_v56 = vld [vmem:[#allocation2 + $0x18] sm:$0xff] }
 0x152   : > { %v422_v57 = vpop.trf.xlu0 }
 0x153   : > { %v632_v58 = vpop.trf.xlu1  ;;  %1849 = vmatmul.msk.f32.vlgmr.msra.gmra.mxu0 %vm438_vm4, %v422_v57 }
 0x154   : > { %1865 = vmatmul.msk.f32.vlgmr.msra.gmra.mxu1 %vm438_vm4, %v632_v58  ;;  %v858_v59 = vpop.trf.xlu2 }
 0x155   : > { %1887 = vmatmul.msk.f32.gmra.mxu2 %vm438_vm4, %v858_v59 }
 0x15a   : > { %v423_v60 = vpop.trf.xlu0 }
 0x15b   : > { %v633_v61 = vpop.trf.xlu1  ;;  %1850 = vmatmul.msk.f32.gmra.mxu0 %vm438_vm4, %v423_v60 }
 0x15c   : > { %1866 = vmatmul.msk.f32.gmra.mxu1 %vm438_vm4, %v633_v61  ;;  %v859_v62 = vpop.trf.xlu2 }
 0x15d   : > { %1888 = vmatmul.msk.f32.gmra.mxu2 %vm438_vm4, %v859_v62 }
 0x162   : > { %v424_v63 = vpop.trf.xlu0 }
 0x163   : > { %v634_v0 = vpop.trf.xlu1  ;;  %1851 = vmatmul.msk.f32.gmra.mxu0 %vm438_vm4, %v424_v63 }
 0x164   : > { %1867 = vmatmul.msk.f32.gmra.mxu1 %vm438_vm4, %v634_v0  ;;  %v860_v1 = vpop.trf.xlu2 }
 0x165   : > { %1889 = vmatmul.msk.f32.gmra.mxu2 %vm438_vm4, %v860_v1  ;;  %v556_v1 = vld [vmem:[#allocation2 + $0x50] sm:$0xff] }
 0x16a   : > { %v425_v2 = vpop.trf.xlu0 }
 0x16b   : > { %v635_v3 = vpop.trf.xlu1  ;;  %1852 = vmatmul.msk.f32.gmra.mxu0 %vm438_vm4, %v425_v2 }
 0x16c   : > { %1868 = vmatmul.msk.f32.gmra.mxu1 %vm438_vm4, %v635_v3  ;;  %v861_v4 = vpop.trf.xlu2 }
 0x16d   : > { %1890 = vmatmul.msk.f32.gmra.mxu2 %vm438_vm4, %v861_v4 }
 0x172   : > { %v426_v5 = vpop.trf.xlu0 }
 0x173   : > { %v636_v6 = vpop.trf.xlu1  ;;  %1853 = vmatmul.msk.f32.gmra.mxu0 %vm438_vm4, %v426_v5 }
 0x174   : > { %1869 = vmatmul.msk.f32.gmra.mxu1 %vm438_vm4, %v636_v6  ;;  %v862_v7 = vpop.trf.xlu2 }
 0x175   : > { %1891 = vmatmul.msk.f32.gmra.mxu2 %vm438_vm4, %v862_v7 }
 0x17a   : > { %v427_v8 = vpop.trf.xlu0 }
 0x17b   : > { %v637_v9 = vpop.trf.xlu1  ;;  %1854 = vmatmul.msk.f32.gmra.mxu0 %vm438_vm4, %v427_v8 }
 0x17c   : > { %1870 = vmatmul.msk.f32.gmra.mxu1 %vm438_vm4, %v637_v9  ;;  %v863_v13 = vpop.trf.xlu2  ;;  %v557_v9 = vld [vmem:[#allocation2 + $0x68] sm:$0xff] }
 0x17d   : > { %1892 = vmatmul.msk.f32.gmra.mxu2 %vm438_vm4, %v863_v13 }
 0x182   : > { %v428_v14 = vpop.trf.xlu0 }
 0x183   : > { %v638_v15 = vpop.trf.xlu1  ;;  %1855 = vmatmul.msk.f32.gmra.mxu0 %vm438_vm4, %v428_v14 }
 0x184   : > { %1871 = vmatmul.msk.f32.gmra.mxu1 %vm438_vm4, %v638_v15  ;;  %v864_v16 = vpop.trf.xlu2 }
 0x185   : > { %1893 = vmatmul.msk.f32.gmra.mxu2 %vm438_vm4, %v864_v16 }
 0x18a   : > { %v429_v20 = vpop.trf.xlu0 }
 0x18b   : > { %v639_v21 = vpop.trf.xlu1  ;;  %1856 = vmatmul.msk.f32.gmra.mxu0 %vm438_vm4, %v429_v20 }
 0x18c   : > { %1872 = vmatmul.msk.f32.gmra.mxu1 %vm438_vm4, %v639_v21  ;;  %v865_v23 = vpop.trf.xlu2 }
 0x18d   : > { %1894 = vmatmul.msk.f32.gmra.mxu2 %vm438_vm4, %v865_v23 }
 0x192   : > { %v430_v25 = vpop.trf.xlu0 }
 0x193   : > { %v640_v26 = vpop.trf.xlu1  ;;  %1857 = vmatmul.msk.f32.gmra.mxu0 %vm438_vm4, %v430_v25  ;;  %v558_v25 = vld [vmem:[#allocation2 + $0x8] sm:$0xff] }
 0x194   : > { %1873 = vmatmul.msk.f32.gmra.mxu1 %vm438_vm4, %v640_v26  ;;  %v866_v28 = vpop.trf.xlu2 }
 0x195   : > { %1895 = vmatmul.msk.f32.gmra.mxu2 %vm438_vm4, %v866_v28 }
 0x19a   : > { %v431_v29 = vpop.trf.xlu0 }
 0x19b   : > { %v641_v30 = vpop.trf.xlu1  ;;  %1858 = vmatmul.msk.f32.gmra.mxu0 %vm438_vm4, %v431_v29 }
 0x19c   : > { %1874 = vmatmul.msk.f32.gmra.mxu1 %vm438_vm4, %v641_v30  ;;  %v867_v31 = vpop.trf.xlu2 }
 0x19d   : > { %1896 = vmatmul.msk.f32.gmra.mxu2 %vm438_vm4, %v867_v31 }
 0x1a2   : > { %v432_v32 = vpop.trf.xlu0 }
 0x1a3   : > { %v642_v33 = vpop.trf.xlu1  ;;  %1859 = vmatmul.msk.f32.gmra.mxu0 %vm438_vm4, %v432_v32 }
 0x1a4   : > { %1875 = vmatmul.msk.f32.gmra.mxu1 %vm438_vm4, %v642_v33  ;;  %v868_v34 = vpop.trf.xlu2  ;;  %v559_v33 = vld [vmem:[#allocation2 + $0x48] sm:$0xff] }
 0x1a5   : > { %1897 = vmatmul.msk.f32.gmra.mxu2 %vm438_vm4, %v868_v34 }
 0x1aa   : > { %v433_v35 = vpop.trf.xlu0 }
 0x1ab   : > { %v643_v36 = vpop.trf.xlu1  ;;  %1860 = vmatmul.msk.f32.gmra.mxu0 %vm438_vm4, %v433_v35 }
 0x1ac   : > { %1876 = vmatmul.msk.f32.gmra.mxu1 %vm438_vm4, %v643_v36  ;;  %v869_v61 = vpop.trf.xlu2 }
 0x1b2   : > { %v434_v37 = vpop.trf.xlu0 }
 0x1b3   : > { %1861 = vmatmul.msk.f32.vlgmr.msra.gmra.mxu3 %vm438_vm4, %v434_v37 }
 0x1b4   : > { %1970 = vmatpush.msk.msra.mxu3 %vm836_vm3, %v2621_v27  ;;  %v644_v27 = vpop.trf.xlu1  ;;  %v870_v6 = vpop.trf.xlu2 }
 0x1b6   : > { %1971 = vmatpush.msk.msra.mxu3 %vm835_vm2, %v2612_v24 }
 0x1b8   : > { %1972 = vmatpush.msk.msra.mxu3 %vm834_vm1, %v2591_v17 }
 0x1ba   : > { %v435_v38 = vpop.trf.xlu0  ;;  %1973 = vmatpush.msk.msra.mxu3 %vm833_vm0, %v2576_v10  ;;  %v553_v10 = vld [vmem:[#allocation2] sm:$0xff] }
 0x1bb   : > { %1862 = vmatmul.msk.f32.gmra.mxu3 %vm438_vm4, %v435_v38 }
 0x1bc   : > { %v645_v41 = vpop.trf.xlu1  ;;  %v871_v21 = vpop.trf.xlu2 }
 0x1c2   : > { %v436_v22 = vpop.trf.xlu0 }
 0x1c3   : > { %1863 = vmatmul.msk.f32.gmra.mxu3 %vm438_vm4, %v436_v22 }
 0x1c4   : > { %v646_v47 = vpop.trf.xlu1  ;;  %v872_v34 = vpop.trf.xlu2 }
 0x1ca   : > { %v437_v39 = vpop.trf.xlu0 }
 0x1cb   : > { %1864 = vmatmul.msk.f32.gmra.mxu3 %vm438_vm4, %v437_v39  ;;  %v560_v39 = vld [vmem:[#allocation2 + $0x40] sm:$0xff] }
 0x1cc   : > { %v647_v57 = vpop.trf.xlu1 }
 0x1d0   : > { %v504_v24 = vpop.f32.mrf.mxu0  ;;  %v938_v17 = vpop.f32.mrf.mxu2 }
 0x1d1   : > { %v713_v40 = vpop.f32.mrf.mxu1  ;;  %v568_v18 = vadd.f32 %v552_v19, %v504_v24 }
 0x1d3   : > { %1877 = vmatmul.msk.f32.vlgmr.msrb.gmra.mxu3 %vm438_vm4, %v644_v27  ;;  %v777_v42 = vadd.f32 %v713_v40, %v568_v18 }
 0x1d5   : > { %v1002_v11 = vadd.f32 %v938_v17, %v777_v42  ;;  %v561_v42 = vld [vmem:[#allocation2 + $0x20] sm:$0xff] }
 0x1d7   : > { %1018 = vst [vmem:[#allocation2 + $0x30] sm:$0xff] %v1002_v11 }
 0x1d8   : > { %v507_v12 = vpop.f32.mrf.mxu0  ;;  %v941_v45 = vpop.f32.mrf.mxu2 }
 0x1d9   : > { %v716_v43 = vpop.f32.mrf.mxu1  ;;  %v569_v44 = vadd.f32 %v553_v10, %v507_v12 }
 0x1db   : > { %1878 = vmatmul.msk.f32.gmra.mxu3 %vm438_vm4, %v645_v41  ;;  %v778_v46 = vadd.f32 %v716_v43, %v569_v44 }
 0x1dd   : > { %v1003_v48 = vadd.f32 %v941_v45, %v778_v46  ;;  %v562_v46 = vld [vmem:[#allocation2 + $0x10] sm:$0xff] }
 0x1df   : > { %1019 = vst [vmem:[#allocation2] sm:$0xff] %v1003_v48 }
 0x1e0   : > { %v510_v50 = vpop.f32.mrf.mxu0  ;;  %v944_v53 = vpop.f32.mrf.mxu2 }
 0x1e1   : > { %v719_v51 = vpop.f32.mrf.mxu1  ;;  %v570_v52 = vadd.f32 %v554_v49, %v510_v50 }
 0x1e3   : > { %1879 = vmatmul.msk.f32.gmra.mxu3 %vm438_vm4, %v646_v47  ;;  %v779_v54 = vadd.f32 %v719_v51, %v570_v52 }
 0x1e5   : > { %v1004_v55 = vadd.f32 %v944_v53, %v779_v54  ;;  %v563_v53 = vld [vmem:[#allocation2 + $0x38] sm:$0xff] }
 0x1e7   : > { %1020 = vst [vmem:[#allocation2 + $0x58] sm:$0xff] %v1004_v55 }
 0x1e8   : > { %v513_v58 = vpop.f32.mrf.mxu0  ;;  %v947_v62 = vpop.f32.mrf.mxu2 }
 0x1e9   : > { %v722_v59 = vpop.f32.mrf.mxu1  ;;  %v571_v60 = vadd.f32 %v555_v56, %v513_v58 }
 0x1eb   : > { %1880 = vmatmul.msk.f32.gmra.mxu3 %vm438_vm4, %v647_v57  ;;  %v780_v63 = vadd.f32 %v722_v59, %v571_v60 }
 0x1ed   : > { %v1005_v0 = vadd.f32 %v947_v62, %v780_v63 }
 0x1ef   : > { %1021 = vst [vmem:[#allocation2 + $0x18] sm:$0xff] %v1005_v0 }
 0x1f0   : > { %v516_v2 = vpop.f32.mrf.mxu0  ;;  %v950_v5 = vpop.f32.mrf.mxu2 }
 0x1f1   : > { %v725_v3 = vpop.f32.mrf.mxu1  ;;  %v572_v4 = vadd.f32 %v556_v1, %v516_v2 }
 0x1f3   : > { %1898 = vmatmul.msk.f32.vlgmr.msra.gmra.mxu3 %vm438_vm4, %v869_v61  ;;  %v781_v7 = vadd.f32 %v725_v3, %v572_v4  ;;  %v564_v4 = vld [vmem:[#allocation2 + $0x60] sm:$0xff] }
 0x1f5   : > { %v1006_v8 = vadd.f32 %v950_v5, %v781_v7 }
 0x1f7   : > { %1022 = vst [vmem:[#allocation2 + $0x50] sm:$0xff] %v1006_v8 }
 0x1f8   : > { %v519_v13 = vpop.f32.mrf.mxu0  ;;  %v953_v16 = vpop.f32.mrf.mxu2 }
 0x1f9   : > { %v728_v14 = vpop.f32.mrf.mxu1  ;;  %v573_v15 = vadd.f32 %v557_v9, %v519_v13  ;;  %v565_v9 = vld [vmem:[#allocation2 + $0x70] sm:$0xff] }
 0x1fb   : > { %1899 = vmatmul.msk.f32.gmra.mxu3 %vm438_vm4, %v870_v6  ;;  %v782_v20 = vadd.f32 %v728_v14, %v573_v15 }
 0x1fd   : > { %v1007_v23 = vadd.f32 %v953_v16, %v782_v20  ;;  %v566_v20 = vld [vmem:[#allocation2 + $0x78] sm:$0xff] }
 0x1ff   : > { %1023 = vst [vmem:[#allocation2 + $0x68] sm:$0xff] %v1007_v23 }
 0x200   : > { %v522_v26 = vpop.f32.mrf.mxu0  ;;  %v956_v30 = vpop.f32.mrf.mxu2 }
 0x201   : > { %v731_v28 = vpop.f32.mrf.mxu1  ;;  %v574_v29 = vadd.f32 %v558_v25, %v522_v26 }
 0x203   : > { %1900 = vmatmul.msk.f32.gmra.mxu3 %vm438_vm4, %v871_v21  ;;  %v783_v31 = vadd.f32 %v731_v28, %v574_v29  ;;  %v567_v28 = vld [vmem:[#allocation2 + $0x28] sm:$0xff] }
 0x205   : > { %v1008_v32 = vadd.f32 %v956_v30, %v783_v31 }
 0x207   : > { %1024 = vst [vmem:[#allocation2 + $0x8] sm:$0xff] %v1008_v32 }
 0x208   : > { %v525_v35 = vpop.f32.mrf.mxu0  ;;  %v959_v38 = vpop.f32.mrf.mxu2 }
 0x209   : > { %v734_v36 = vpop.f32.mrf.mxu1  ;;  %v575_v37 = vadd.f32 %v559_v33, %v525_v35 }
 0x20b   : > { %1901 = vmatmul.msk.f32.gmra.mxu3 %vm438_vm4, %v872_v34  ;;  %v784_v22 = vadd.f32 %v734_v36, %v575_v37 }
 0x20d   : > { %v1009_v27 = vadd.f32 %v959_v38, %v784_v22 }
 0x20f   : > { %1025 = vst [vmem:[#allocation2 + $0x48] sm:$0xff] %v1009_v27 }
 0x210   : > { %v528_v19 = vpop.f32.mrf.mxu0  ;;  %v962_v18 = vpop.f32.mrf.mxu2 }
 0x211   : > { %v737_v24 = vpop.f32.mrf.mxu1  ;;  %v576_v40 = vadd.f32 %v560_v39, %v528_v19 }
 0x213   : > { %v785_v17 = vadd.f32 %v737_v24, %v576_v40 }
 0x215   : > { %v1010_v41 = vadd.f32 %v962_v18, %v785_v17 }
 0x217   : > { %1026 = vst [vmem:[#allocation2 + $0x40] sm:$0xff] %v1010_v41 }
 0x218   : > { %v531_v11 = vpop.f32.mrf.mxu0  ;;  %v965_v43 = vpop.f32.mrf.mxu2 }
 0x219   : > { %v740_v10 = vpop.f32.mrf.mxu1  ;;  %v577_v12 = vadd.f32 %v561_v42, %v531_v11 }
 0x21b   : > { %v786_v44 = vadd.f32 %v740_v10, %v577_v12 }
 0x21d   : > { %v1011_v45 = vadd.f32 %v965_v43, %v786_v44 }
 0x21f   : > { %1027 = vst [vmem:[#allocation2 + $0x20] sm:$0xff] %v1011_v45 }
 0x220   : > { %v534_v47 = vpop.f32.mrf.mxu0  ;;  %v968_v50 = vpop.f32.mrf.mxu2 }
 0x221   : > { %v743_v48 = vpop.f32.mrf.mxu1  ;;  %v578_v49 = vadd.f32 %v562_v46, %v534_v47 }
 0x223   : > { %v787_v51 = vadd.f32 %v743_v48, %v578_v49 }
 0x225   : > { %v1012_v52 = vadd.f32 %v968_v50, %v787_v51 }
 0x227   : > { %1028 = vst [vmem:[#allocation2 + $0x10] sm:$0xff] %v1012_v52 }
 0x228   : > { %v537_v54 = vpop.f32.mrf.mxu0  ;;  %v971_v57 = vpop.f32.mrf.mxu2 }
 0x229   : > { %v746_v55 = vpop.f32.mrf.mxu1  ;;  %v579_v56 = vadd.f32 %v563_v53, %v537_v54 }
 0x22b   : > { %v788_v58 = vadd.f32 %v746_v55, %v579_v56 }
 0x22d   : > { %v1013_v59 = vadd.f32 %v971_v57, %v788_v58 }
 0x22f   : > { %1029 = vst [vmem:[#allocation2 + $0x38] sm:$0xff] %v1013_v59 }
 0x236   : > { %v540_v60 = vpop.f32.mrf.mxu3 }
 0x237   : > { %v580_v5 = vadd.f32 %v564_v4, %v540_v60 }
 0x23e   : > { %v543_v61 = vpop.f32.mrf.mxu3 }
 0x23f   : > { %v581_v13 = vadd.f32 %v565_v9, %v543_v61 }
 0x246   : > { %v546_v62 = vpop.f32.mrf.mxu3 }
 0x247   : > { %v582_v21 = vadd.f32 %v566_v20, %v546_v62 }
 0x24e   : > { %v549_v63 = vpop.f32.mrf.mxu3 }
 0x24f   : > { %v583_v29 = vadd.f32 %v567_v28, %v549_v63 }
 0x256   : > { %v749_v0 = vpop.f32.mrf.mxu3 }
 0x257   : > { %v789_v6 = vadd.f32 %v749_v0, %v580_v5 }
 0x25e   : > { %v752_v1 = vpop.f32.mrf.mxu3 }
 0x25f   : > { %v790_v14 = vadd.f32 %v752_v1, %v581_v13 }
 0x266   : > { %v755_v2 = vpop.f32.mrf.mxu3 }
 0x267   : > { %v791_v23 = vadd.f32 %v755_v2, %v582_v21 }
 0x26e   : > { %v758_v3 = vpop.f32.mrf.mxu3 }
 0x26f   : > { %v792_v30 = vadd.f32 %v758_v3, %v583_v29 }
 0x276   : > { %v974_v7 = vpop.f32.mrf.mxu3 }
 0x277   : > { %v1014_v8 = vadd.f32 %v974_v7, %v789_v6 }
 0x279   : > { %1030 = vst [vmem:[#allocation2 + $0x60] sm:$0xff] %v1014_v8 }
 0x27e   : > { %v977_v15 = vpop.f32.mrf.mxu3 }
 0x27f   : > { %v1015_v16 = vadd.f32 %v977_v15, %v790_v14 }
 0x281   : > { %1031 = vst [vmem:[#allocation2 + $0x70] sm:$0xff] %v1015_v16 }
 0x286   : > { %v980_v25 = vpop.f32.mrf.mxu3 }
 0x287   : > { %v1016_v26 = vadd.f32 %v980_v25, %v791_v23 }
 0x289   : > { %1032 = vst [vmem:[#allocation2 + $0x78] sm:$0xff] %v1016_v26 }
 0x28e   : > { %v983_v31 = vpop.f32.mrf.mxu3 }
 0x28f   : > { %v1017_v32 = vadd.f32 %v983_v31, %v792_v30 }
 0x291   : > { %1033 = vst [vmem:[#allocation2 + $0x28] sm:$0xff] %v1017_v32 }
 0x292 PF: > { %p1902_p0 = scmp.ge.s32.totalorder %s2363_s22, 3 }
 0x294   : > { %1049 = sbr.rel (%p1902_p0) target bundleno = 1086 (0x43e), region = 64 }
 0x299   : > { %v1050_v33 = vld [vmem:[%s2551_s15] sm:$0xff]  ;;  %v1051_v34 = vld [vmem:[%s2551_s15 + $0x8] sm:$0xff]  ;;  %v1053_v36 = vld [vmem:[%s2551_s15 + $0x18] sm:$0xff]  ;;  %vm1086_vm5 = vcmask 261120  }
 0x29a   : > { %1054 = vxpose.xlu0.b32.start [1/4] (short) %v1050_v33, 128  ;;  %v1249_v35 = vadd.f32 %v1051_v34, %v1050_v33  ;;  %v1052_v37 = vld [vmem:[%s2551_s15 + $0x10] sm:$0xff]  ;;  %1147 = vmatpush.msra.mxu0 %v1053_v36  ;;  %v1248_v18 = vld [vmem:[#allocation4] sm:$0x1]  ;;  %v1205_v6 = vld [vmem:[#allocation2 + $0x68] sm:$0xff] }
 0x29b   : > { %1974 = vmatpush.msra.mxu1 %v1053_v36  ;;  %1975 = vmatpush.msra.mxu2 %v1053_v36  ;;  %v1200_v55 = vld [vmem:[#allocation2 + $0x30] sm:$0xff]  ;;  %v1201_v58 = vld [vmem:[#allocation2] sm:$0xff]  ;;  %v1202_v61 = vld [vmem:[#allocation2 + $0x58] sm:$0xff] }
 0x29c   : > { %v1250_v38 = vadd.f32 %v1249_v35, %v1052_v37  ;;  %1976 = vmatpush.msra.mxu3 %v1053_v36  ;;  %1148 = vmatpush.msra.mxu0 %v1052_v37  ;;  %v1203_v0 = vld [vmem:[#allocation2 + $0x18] sm:$0xff]  ;;  %v1204_v3 = vld [vmem:[#allocation2 + $0x50] sm:$0xff]  ;;  %v1206_v9 = vld [vmem:[#allocation2 + $0x8] sm:$0xff] }
 0x29d   : > { %1977 = vmatpush.msra.mxu1 %v1052_v37  ;;  %1978 = vmatpush.msra.mxu2 %v1052_v37  ;;  %v1207_v15 = vld [vmem:[#allocation2 + $0x48] sm:$0xff]  ;;  %v1208_v21 = vld [vmem:[#allocation2 + $0x40] sm:$0xff]  ;;  %v1210_v30 = vld [vmem:[#allocation2 + $0x10] sm:$0xff] }
 0x29e   : > { %v1251_v22 = vadd.f32 %v1250_v38, %v1053_v36  ;;  %1979 = vmatpush.msra.mxu3 %v1052_v37  ;;  %1149 = vmatpush.msra.mxu0 %v1051_v34  ;;  %v1209_v26 = vld [vmem:[#allocation2 + $0x20] sm:$0xff] }
 0x29f   : > { %1980 = vmatpush.msra.mxu1 %v1051_v34  ;;  %1981 = vmatpush.msra.mxu2 %v1051_v34 }
 0x2a0   : > { %v1252_v27 = vrot.slane %v1251_v22, 4  ;;  %1982 = vmatpush.msra.mxu3 %v1051_v34  ;;  %1150 = vmatpush.msra.mxu0 %v1050_v33 }
 0x2a1   : > { %1983 = vmatpush.msra.mxu1 %v1050_v33  ;;  %1984 = vmatpush.msra.mxu2 %v1050_v33 }
 0x2a2   : > { %1055 = vxpose.xlu0.b32.cont [2/4] (short) %v1051_v34, 128  ;;  %v1253_v39 = vadd.f32 %v1252_v27, %v1251_v22  ;;  %1985 = vmatpush.msra.mxu3 %v1050_v33  ;;  %v1211_v33 = vld [vmem:[#allocation2 + $0x38] sm:$0xff]  ;;  %v1213_v22 = vld [vmem:[#allocation2 + $0x70] sm:$0xff] }
 0x2a4   : > { %v1254_v19 = vrot.slane %v1253_v39, 2 }
 0x2a6   : > { %v1255_v24 = vadd.f32 %v1254_v19, %v1253_v39  ;;  %v1214_v19 = vld [vmem:[#allocation2 + $0x78] sm:$0xff] }
 0x2a8   : > { %v1256_v40 = vrot.slane %v1255_v24, 1 }
 0x2aa   : > { %1056 = vxpose.xlu0.b32.cont [3/4] (short) %v1052_v37, 128  ;;  %v1257_v17 = vadd.f32 %v1256_v40, %v1255_v24 }
 0x2ac   : > { %v1258_v41 = vadd.f32 %v1257_v17, %v1248_v18  ;;  %v1215_v18 = vld [vmem:[#allocation2 + $0x28] sm:$0xff] }
 0x2ae   : > { %1259 = vst [vmem:[#allocation4] sm:$0x1] %v1258_v41 }
 0x2b2   : > { %1057 = vxpose.xlu0.b32.end [4/4] (short) %v1053_v36, 128  ;;  %v1212_v36 = vld [vmem:[#allocation2 + $0x60] sm:$0xff] }
 0x33e   : > { %v1070_v42 = vpop.trf.xlu0 }
 0x33f   : > { %1903 = vmatmul.msk.f32.vlgmr.msra.gmra.mxu0 %vm1086_vm5, %v1070_v42 }
 0x346   : > { %v1071_v11 = vpop.trf.xlu0 }
 0x347   : > { %1904 = vmatmul.msk.f32.gmra.mxu0 %vm1086_vm5, %v1071_v11 }
 0x34e   : > { %v1072_v10 = vpop.trf.xlu0 }
 0x34f   : > { %1905 = vmatmul.msk.f32.gmra.mxu0 %vm1086_vm5, %v1072_v10 }
 0x356   : > { %v1073_v12 = vpop.trf.xlu0 }
 0x357   : > { %1906 = vmatmul.msk.f32.gmra.mxu0 %vm1086_vm5, %v1073_v12 }
 0x35e   : > { %v1074_v43 = vpop.trf.xlu0 }
 0x35f   : > { %1907 = vmatmul.msk.f32.vlgmr.msra.gmra.mxu1 %vm1086_vm5, %v1074_v43 }
 0x366   : > { %v1075_v44 = vpop.trf.xlu0 }
 0x367   : > { %1908 = vmatmul.msk.f32.gmra.mxu1 %vm1086_vm5, %v1075_v44 }
 0x36e   : > { %v1076_v45 = vpop.trf.xlu0 }
 0x36f   : > { %1909 = vmatmul.msk.f32.gmra.mxu1 %vm1086_vm5, %v1076_v45 }
 0x376   : > { %v1077_v46 = vpop.trf.xlu0 }
 0x377   : > { %1910 = vmatmul.msk.f32.gmra.mxu1 %vm1086_vm5, %v1077_v46 }
 0x37e   : > { %v1078_v47 = vpop.trf.xlu0 }
 0x37f   : > { %1911 = vmatmul.msk.f32.vlgmr.msra.gmra.mxu2 %vm1086_vm5, %v1078_v47 }
 0x386   : > { %v1079_v48 = vpop.trf.xlu0 }
 0x387   : > { %1912 = vmatmul.msk.f32.gmra.mxu2 %vm1086_vm5, %v1079_v48 }
 0x38e   : > { %v1080_v49 = vpop.trf.xlu0 }
 0x38f   : > { %1913 = vmatmul.msk.f32.gmra.mxu2 %vm1086_vm5, %v1080_v49 }
 0x396   : > { %v1081_v50 = vpop.trf.xlu0 }
 0x397   : > { %1914 = vmatmul.msk.f32.gmra.mxu2 %vm1086_vm5, %v1081_v50 }
 0x39e   : > { %v1082_v51 = vpop.trf.xlu0 }
 0x39f   : > { %1915 = vmatmul.msk.f32.vlgmr.msra.gmra.mxu3 %vm1086_vm5, %v1082_v51 }
 0x3a6   : > { %v1083_v52 = vpop.trf.xlu0 }
 0x3a7   : > { %1916 = vmatmul.msk.f32.gmra.mxu3 %vm1086_vm5, %v1083_v52 }
 0x3ae   : > { %v1084_v53 = vpop.trf.xlu0 }
 0x3af   : > { %1917 = vmatmul.msk.f32.gmra.mxu3 %vm1086_vm5, %v1084_v53 }
 0x3b6   : > { %v1085_v54 = vpop.trf.xlu0 }
 0x3b7   : > { %1918 = vmatmul.msk.f32.gmra.mxu3 %vm1086_vm5, %v1085_v54 }
 0x3bc   : > { %v1152_v56 = vpop.f32.mrf.mxu0 }
 0x3bd   : > { %v1216_v57 = vsub.f32 %v1200_v55, %v1152_v56 }
 0x3bf   : > { %1232 = vst [vmem:[#allocation2 + $0x30] sm:$0xff] %v1216_v57 }
 0x3c4   : > { %v1155_v59 = vpop.f32.mrf.mxu0 }
 0x3c5   : > { %v1217_v60 = vsub.f32 %v1201_v58, %v1155_v59 }
 0x3c7   : > { %1233 = vst [vmem:[#allocation2] sm:$0xff] %v1217_v60 }
 0x3cc   : > { %v1158_v62 = vpop.f32.mrf.mxu0 }
 0x3cd   : > { %v1218_v63 = vsub.f32 %v1202_v61, %v1158_v62 }
 0x3cf   : > { %1234 = vst [vmem:[#allocation2 + $0x58] sm:$0xff] %v1218_v63 }
 0x3d4   : > { %v1161_v1 = vpop.f32.mrf.mxu0 }
 0x3d5   : > { %v1219_v2 = vsub.f32 %v1203_v0, %v1161_v1 }
 0x3d7   : > { %1235 = vst [vmem:[#allocation2 + $0x18] sm:$0xff] %v1219_v2 }
 0x3dc   : > { %v1164_v4 = vpop.f32.mrf.mxu1 }
 0x3dd   : > { %v1220_v5 = vsub.f32 %v1204_v3, %v1164_v4 }
 0x3df   : > { %1236 = vst [vmem:[#allocation2 + $0x50] sm:$0xff] %v1220_v5 }
 0x3e4   : > { %v1167_v7 = vpop.f32.mrf.mxu1 }
 0x3e5   : > { %v1221_v8 = vsub.f32 %v1205_v6, %v1167_v7 }
 0x3e7   : > { %1237 = vst [vmem:[#allocation2 + $0x68] sm:$0xff] %v1221_v8 }
 0x3ec   : > { %v1170_v13 = vpop.f32.mrf.mxu1 }
 0x3ed   : > { %v1222_v14 = vsub.f32 %v1206_v9, %v1170_v13 }
 0x3ef   : > { %1238 = vst [vmem:[#allocation2 + $0x8] sm:$0xff] %v1222_v14 }
 0x3f4   : > { %v1173_v16 = vpop.f32.mrf.mxu1 }
 0x3f5   : > { %v1223_v20 = vsub.f32 %v1207_v15, %v1173_v16 }
 0x3f7   : > { %1239 = vst [vmem:[#allocation2 + $0x48] sm:$0xff] %v1223_v20 }
 0x402   : > { %v1176_v23 = vpop.f32.mrf.mxu2 }
 0x403   : > { %v1224_v25 = vsub.f32 %v1208_v21, %v1176_v23 }
 0x405   : > { %1240 = vst [vmem:[#allocation2 + $0x40] sm:$0xff] %v1224_v25 }
 0x40a   : > { %v1179_v28 = vpop.f32.mrf.mxu2 }
 0x40b   : > { %v1225_v29 = vsub.f32 %v1209_v26, %v1179_v28 }
 0x40d   : > { %1241 = vst [vmem:[#allocation2 + $0x20] sm:$0xff] %v1225_v29 }
 0x412   : > { %v1182_v31 = vpop.f32.mrf.mxu2 }
 0x413   : > { %v1226_v32 = vsub.f32 %v1210_v30, %v1182_v31 }
 0x415   : > { %1242 = vst [vmem:[#allocation2 + $0x10] sm:$0xff] %v1226_v32 }
 0x41a   : > { %v1185_v34 = vpop.f32.mrf.mxu2 }
 0x41b   : > { %v1227_v35 = vsub.f32 %v1211_v33, %v1185_v34 }
 0x41d   : > { %1243 = vst [vmem:[#allocation2 + $0x38] sm:$0xff] %v1227_v35 }
 0x422   : > { %v1188_v37 = vpop.f32.mrf.mxu3 }
 0x423   : > { %v1228_v38 = vsub.f32 %v1212_v36, %v1188_v37 }
 0x425   : > { %1244 = vst [vmem:[#allocation2 + $0x60] sm:$0xff] %v1228_v38 }
 0x42a   : > { %v1191_v27 = vpop.f32.mrf.mxu3 }
 0x42b   : > { %v1229_v39 = vsub.f32 %v1213_v22, %v1191_v27 }
 0x42d   : > { %1245 = vst [vmem:[#allocation2 + $0x70] sm:$0xff] %v1229_v39 }
 0x432   : > { %v1194_v24 = vpop.f32.mrf.mxu3 }
 0x433   : > { %v1230_v40 = vsub.f32 %v1214_v19, %v1194_v24 }
 0x435   : > { %1246 = vst [vmem:[#allocation2 + $0x78] sm:$0xff] %v1230_v40 }
 0x43a   : > { %v1197_v17 = vpop.f32.mrf.mxu3 }
 0x43b   : > { %v1231_v41 = vsub.f32 %v1215_v18, %v1197_v17 }
 0x43d   : > { %1247 = vst [vmem:[#allocation2 + $0x28] sm:$0xff] %v1231_v41 }
 0x43e PF: > { %p1919_p11 = scmp.ne.s32.totalorder %s2363_s22, 2 }
 0x440   : > { %1263 = sbr.rel (%p1919_p11) target bundleno = 1832 (0x728), region = 68 }
 0x445   : > { %v1264_v42 = vld [vmem:[#allocation3] sm:$0x1]  ;;  %v1266_v10 = vld [vmem:[#allocation4] sm:$0x1]  ;;  %vm1349_vm6 = vcmask 1040384   ;;  %vm1300_vm7 = vcmask 7168  }
 0x446   : > { %v1265_v11 = vmul.f32 0.0054347827, %v1264_v42  ;;  %v1267_v12 = vmul.f32 0.010416667, %v1266_v10  ;;  %v1567_v24 = vld [vmem:[#allocation2] sm:$0xff]  ;;  %v1566_v18 = vld [vmem:[#allocation2 + $0x30] sm:$0xff] }
 0x447   : > { %v1568_v42 = vld [vmem:[#allocation2 + $0x58] sm:$0xff]  ;;  %vm1696_vm9 = vcmask 0  }
 0x448   : > { %1268 = vxpose.xlu0.b32.start.end [1/1] (short) %v1265_v11, 128  ;;  %1920 = vmatpush.msk.msra.mxu0 %vm1349_vm6, %v1265_v11 }
 0x449   : > { %1986 = vmatpush.msk.msra.mxu2 %vm1349_vm6, %v1265_v11  ;;  %1937 = vmatpush.msk.msra.mxu1 %vm1349_vm6, %v1267_v12 }
 0x44a   : > { %1987 = vmatpush.msk.msra.mxu3 %vm1349_vm6, %v1267_v12 }
 0x4c8   : > { %1418 = vxpose.xlu0.b32.start.end [1/1] (short) %v1267_v12, 128 }
 0x4ec   : > { %v1284_v43 = vpop.trf.xlu0 }
 0x4ed   : > { %1921 = vmatmul.msk.f32.vlgmr.msra.gmra.mxu0 %vm1300_vm7, %v1284_v43 }
 0x4f4   : > { %v1285_v44 = vpop.trf.xlu0 }
 0x4f5   : > { %1922 = vmatmul.msk.f32.gmra.mxu0 %vm1300_vm7, %v1285_v44 }
 0x4fc   : > { %v1286_v45 = vpop.trf.xlu0 }
 0x4fd   : > { %1923 = vmatmul.msk.f32.gmra.mxu0 %vm1300_vm7, %v1286_v45 }
 0x504   : > { %v1287_v46 = vpop.trf.xlu0 }
 0x505   : > { %1924 = vmatmul.msk.f32.gmra.mxu0 %vm1300_vm7, %v1287_v46  ;;  %v1569_v46 = vld [vmem:[#allocation2 + $0x18] sm:$0xff] }
 0x50c   : > { %v1288_v47 = vpop.trf.xlu0 }
 0x50d   : > { %1925 = vmatmul.msk.f32.gmra.mxu0 %vm1300_vm7, %v1288_v47 }
 0x514   : > { %v1289_v48 = vpop.trf.xlu0 }
 0x515   : > { %1926 = vmatmul.msk.f32.gmra.mxu0 %vm1300_vm7, %v1289_v48 }
 0x51c   : > { %v1290_v49 = vpop.trf.xlu0 }
 0x51d   : > { %1927 = vmatmul.msk.f32.gmra.mxu0 %vm1300_vm7, %v1290_v49 }
 0x524   : > { %v1291_v50 = vpop.trf.xlu0 }
 0x525   : > { %1928 = vmatmul.msk.f32.gmra.mxu0 %vm1300_vm7, %v1291_v50 }
 0x52c   : > { %v1292_v51 = vpop.trf.xlu0 }
 0x52d   : > { %1929 = vmatmul.msk.f32.vlgmr.msra.gmra.mxu2 %vm1300_vm7, %v1292_v51  ;;  %v1570_v51 = vld [vmem:[#allocation2 + $0x50] sm:$0xff] }
 0x534   : > { %v1293_v52 = vpop.trf.xlu0 }
 0x535   : > { %1930 = vmatmul.msk.f32.gmra.mxu2 %vm1300_vm7, %v1293_v52 }
 0x53c   : > { %v1294_v53 = vpop.trf.xlu0 }
 0x53d   : > { %1931 = vmatmul.msk.f32.gmra.mxu2 %vm1300_vm7, %v1294_v53 }
 0x544   : > { %v1295_v54 = vpop.trf.xlu0 }
 0x545   : > { %1932 = vmatmul.msk.f32.gmra.mxu2 %vm1300_vm7, %v1295_v54  ;;  %v1571_v54 = vld [vmem:[#allocation2 + $0x68] sm:$0xff] }
 0x54c   : > { %v1296_v55 = vpop.trf.xlu0 }
 0x54d   : > { %1933 = vmatmul.msk.f32.gmra.mxu2 %vm1300_vm7, %v1296_v55 }
 0x554   : > { %v1297_v56 = vpop.trf.xlu0 }
 0x555   : > { %1934 = vmatmul.msk.f32.gmra.mxu2 %vm1300_vm7, %v1297_v56 }
 0x55c   : > { %v1298_v57 = vpop.trf.xlu0 }
 0x55d   : > { %1935 = vmatmul.msk.f32.gmra.mxu2 %vm1300_vm7, %v1298_v57 }
 0x564   : > { %v1299_v58 = vpop.trf.xlu0 }
 0x565   : > { %1936 = vmatmul.msk.f32.gmra.mxu2 %vm1300_vm7, %v1299_v58 }
 0x56a   : > { %v1370_v14 = vpop.f32.mrf.mxu0 }
 0x56b   : > { %v1582_v19 = vmul.f32 184.0, %v1370_v14 }
 0x56c   : > { %v1434_v59 = vpop.trf.xlu0 }
 0x56d   : > { %1938 = vmatmul.msk.f32.vlgmr.msra.gmra.mxu1 %vm1300_vm7, %v1434_v59  ;;  %v1598_v45 = vsub.f32 %v1566_v18, %v1582_v19 }
 0x572   : > { %v1373_v16 = vpop.f32.mrf.mxu0 }
 0x573   : > { %v1583_v39 = vmul.f32 184.0, %v1373_v16  ;;  %v1574_v16 = vld [vmem:[#allocation2 + $0x40] sm:$0xff] }
 0x574   : > { %v1435_v60 = vpop.trf.xlu0 }
 0x575   : > { %1939 = vmatmul.msk.f32.gmra.mxu1 %vm1300_vm7, %v1435_v60  ;;  %v1599_v10 = vsub.f32 %v1567_v24, %v1583_v39 }
 0x57a   : > { %v1376_v21 = vpop.f32.mrf.mxu0 }
 0x57b   : > { %v1584_v17 = vmul.f32 184.0, %v1376_v21 }
 0x57c   : > { %v1436_v61 = vpop.trf.xlu0 }
 0x57d   : > { %1940 = vmatmul.msk.f32.gmra.mxu1 %vm1300_vm7, %v1436_v61  ;;  %v1600_v47 = vsub.f32 %v1568_v42, %v1584_v17 }
 0x582   : > { %v1379_v26 = vpop.f32.mrf.mxu0 }
 0x583   : > { %v1585_v12 = vmul.f32 184.0, %v1379_v26 }
 0x584   : > { %v1437_v62 = vpop.trf.xlu0 }
 0x585   : > { %1941 = vmatmul.msk.f32.gmra.mxu1 %vm1300_vm7, %v1437_v62  ;;  %v1601_v53 = vsub.f32 %v1569_v46, %v1585_v12  ;;  %v1572_v62 = vld [vmem:[#allocation2 + $0x8] sm:$0xff] }
 0x58a   : > { %v1382_v30 = vpop.f32.mrf.mxu0 }
 0x58b   : > { %v1586_v48 = vmul.f32 184.0, %v1382_v30 }
 0x58c   : > { %v1438_v63 = vpop.trf.xlu0 }
 0x58d   : > { %1942 = vmatmul.msk.f32.gmra.mxu1 %vm1300_vm7, %v1438_v63  ;;  %v1602_v61 = vsub.f32 %v1570_v51, %v1586_v48  ;;  %v1578_v48 = vld [vmem:[#allocation2 + $0x60] sm:$0xff] }
 0x592   : > { %v1385_v35 = vpop.f32.mrf.mxu0 }
 0x593   : > { %v1587_v52 = vmul.f32 184.0, %v1385_v35 }
 0x594   : > { %v1439_v0 = vpop.trf.xlu0 }
 0x595   : > { %1943 = vmatmul.msk.f32.gmra.mxu1 %vm1300_vm7, %v1439_v0 }
 0x59a   : > { %v1388_v22 = vpop.f32.mrf.mxu0 }
 0x59b   : > { %v1588_v59 = vmul.f32 184.0, %v1388_v22 }
 0x59c   : > { %v1440_v1 = vpop.trf.xlu0 }
 0x59d   : > { %1944 = vmatmul.msk.f32.gmra.mxu1 %vm1300_vm7, %v1440_v1  ;;  %v1604_v14 = vsub.f32 %v1572_v62, %v1588_v59 }
 0x5a2   : > { %v1391_v55 = vpop.f32.mrf.mxu0 }
 0x5a4   : > { %v1441_v2 = vpop.trf.xlu0 }
 0x5a5   : > { %1945 = vmatmul.msk.f32.gmra.mxu1 %vm1300_vm7, %v1441_v2  ;;  %v1603_v2 = vsub.f32 %v1571_v54, %v1587_v52 }
 0x5ac   : > { %v1442_v3 = vpop.trf.xlu0 }
 0x5ad   : > { %1946 = vmatmul.msk.f32.vlgmr.msra.gmra.mxu3 %vm1300_vm7, %v1442_v3  ;;  %v1589_v3 = vmul.f32 184.0, %v1391_v55 }
 0x5b0   : > { %v1394_v23 = vpop.f32.mrf.mxu2 }
 0x5b4   : > { %v1443_v4 = vpop.trf.xlu0 }
 0x5b5   : > { %1947 = vmatmul.msk.f32.gmra.mxu3 %vm1300_vm7, %v1443_v4 }
 0x5b8   : > { %v2775_v28 = vpop.f32.mrf.mxu2 }
 0x5b9   : > { %v1591_v30 = vmul.f32 184.0, %v2775_v28 }
 0x5bc   : > { %v1444_v5 = vpop.trf.xlu0 }
 0x5bd   : > { %1948 = vmatmul.msk.f32.gmra.mxu3 %vm1300_vm7, %v1444_v5 }
 0x5c0   : > { %v2777_v31 = vpop.f32.mrf.mxu2 }
 0x5c1   : > { %v1592_v24 = vmul.f32 184.0, %v2777_v31 }
 0x5c4   : > { %v1445_v6 = vpop.trf.xlu0 }
 0x5c5   : > { %1949 = vmatmul.msk.f32.gmra.mxu3 %vm1300_vm7, %v1445_v6  ;;  %v1573_v6 = vld [vmem:[#allocation2 + $0x48] sm:$0xff] }
 0x5c8   : > { %v2783_v36 = vpop.f32.mrf.mxu2 }
 0x5cc   : > { %v1446_v7 = vpop.trf.xlu0 }
 0x5cd   : > { %1950 = vmatmul.msk.f32.gmra.mxu3 %vm1300_vm7, %v1446_v7 }
 0x5d0   : > { %v2787_v27 = vpop.f32.mrf.mxu2 }
 0x5d1   : > { %v1594_v31 = vmul.f32 184.0, %v2787_v27 }
 0x5d4   : > { %v1447_v8 = vpop.trf.xlu0 }
 0x5d5   : > { %1951 = vmatmul.msk.f32.gmra.mxu3 %vm1300_vm7, %v1447_v8 }
 0x5d8   : > { %v1409_v60 = vpop.f32.mrf.mxu2 }
 0x5dc   : > { %v1448_v9 = vpop.trf.xlu0 }
 0x5dd   : > { %1952 = vmatmul.msk.f32.gmra.mxu3 %vm1300_vm7, %v1448_v9 }
 0x5e0   : > { %v1412_v12 = vpop.f32.mrf.mxu2 }
 0x5e1   : > { %v1596_v59 = vmul.f32 184.0, %v1412_v12 }
 0x5e4   : > { %v1449_v13 = vpop.trf.xlu0 }
 0x5e5   : > { %1953 = vmatmul.msk.f32.gmra.mxu3 %vm1300_vm7, %v1449_v13 }
 0x5ea   : > { %v1518_v15 = vpop.f32.mrf.mxu1 }
 0x5eb   : > { %v1614_v43 = vmul.f32 96.0, %v1518_v15  ;;  %v1590_v15 = vmul.f32 184.0, %v1394_v23 }
 0x5ed   : > { %v1630_v56 = vadd.f32 %v1614_v43, %v1598_v45  ;;  %v1606_v19 = vsub.f32 %v1574_v16, %v1590_v15  ;;  %v1577_v43 = vld [vmem:[#allocation2 + $0x38] sm:$0xff]  ;;  %v1581_v16 = vld [vmem:[#allocation2 + $0x28] sm:$0xff] }
 0x5ef   : > { %v1646_v7 = vmul.f32 %v1630_v56, %v1630_v56 }
 0x5f2   : > { %v1521_v20 = vpop.f32.mrf.mxu1 }
 0x5f3   : > { %v1615_v41 = vmul.f32 96.0, %v1521_v20 }
 0x5f5   : > { %v1631_v49 = vadd.f32 %v1615_v41, %v1599_v10  ;;  %v1593_v10 = vmul.f32 184.0, %v2783_v36  ;;  %v1579_v36 = vld [vmem:[#allocation2 + $0x70] sm:$0xff] }
 0x5f7   : > { %v1647_v63 = vmul.f32 %v1631_v49, %v1631_v49  ;;  %v1609_v52 = vsub.f32 %v1577_v43, %v1593_v10 }
 0x5f9   : > { %v1662_v20 = vadd.f32 %v1647_v63, %v1646_v7 }
 0x5fa   : > { %v1524_v25 = vpop.f32.mrf.mxu1 }
 0x5fb   : > { %v1616_v44 = vmul.f32 96.0, %v1524_v25 }
 0x5fd   : > { %v1632_v57 = vadd.f32 %v1616_v44, %v1600_v47 }
 0x5ff   : > { %v1648_v8 = vmul.f32 %v1632_v57, %v1632_v57 }
 0x601   : > { %v1663_v35 = vadd.f32 %v1662_v20, %v1648_v8 }
 0x602   : > { %v1527_v29 = vpop.f32.mrf.mxu1 }
 0x603   : > { %v1617_v50 = vmul.f32 96.0, %v1527_v29  ;;  %v1605_v29 = vsub.f32 %v1573_v6, %v1589_v3  ;;  %v1415_v6 = vpop.f32.mrf.mxu2 }
 0x605   : > { %v1633_v0 = vadd.f32 %v1617_v50, %v1601_v53  ;;  %v1595_v53 = vmul.f32 184.0, %v1409_v60 }
 0x607   : > { %v1649_v21 = vmul.f32 %v1633_v0, %v1633_v0  ;;  %v1611_v27 = vsub.f32 %v1579_v36, %v1595_v53  ;;  %v1580_v0 = vld [vmem:[#allocation2 + $0x78] sm:$0xff] }
 0x608   : > { %v1612_v60 = vsub.f32 %v1580_v0, %v1596_v59 }
 0x609   : > { %v1664_v18 = vadd.f32 %v1663_v35, %v1649_v21 }
 0x60a   : > { %v1530_v33 = vpop.f32.mrf.mxu1 }
 0x60b   : > { %v1618_v58 = vmul.f32 96.0, %v1530_v33  ;;  %v1575_v33 = vld [vmem:[#allocation2 + $0x20] sm:$0xff] }
 0x60c   : > { %v1607_v42 = vsub.f32 %v1575_v33, %v1591_v30 }
 0x60d   : > { %v1634_v9 = vadd.f32 %v1618_v58, %v1602_v61  ;;  %v1610_v58 = vsub.f32 %v1578_v48, %v1594_v31 }
 0x612   : > { %v1533_v37 = vpop.f32.mrf.mxu1 }
 0x613   : > { %v1619_v1 = vmul.f32 96.0, %v1533_v37  ;;  %v1650_v37 = vmul.f32 %v1634_v9, %v1634_v9 }
 0x615   : > { %v1635_v25 = vadd.f32 %v1619_v1, %v1603_v2  ;;  %v1665_v44 = vadd.f32 %v1664_v18, %v1650_v37 }
 0x617   : > { %v1651_v23 = vmul.f32 %v1635_v25, %v1635_v25 }
 0x619   : > { %v1666_v49 = vadd.f32 %v1665_v44, %v1651_v23 }
 0x61a   : > { %v1536_v40 = vpop.f32.mrf.mxu1 }
 0x61b   : > { %v1620_v13 = vmul.f32 96.0, %v1536_v40  ;;  %v1576_v40 = vld [vmem:[#allocation2 + $0x10] sm:$0xff] }
 0x61c   : > { %v1608_v47 = vsub.f32 %v1576_v40, %v1592_v24  ;;  %v2302_v24 = vmov 16384.0  }
 0x61d   : > { %v1636_v22 = vadd.f32 %v1620_v13, %v1604_v14  ;;  %v1597_v13 = vmul.f32 184.0, %v1415_v6  ;;  %2071 = vrcp.f32 %v2302_v24 }
 0x61f   : > { %v1652_v45 = vmul.f32 %v1636_v22, %v1636_v22 }
 0x621   : > { %v1667_v54 = vadd.f32 %v1666_v49, %v1652_v45 }
 0x622   : > { %v1539_v4 = vpop.f32.mrf.mxu1 }
 0x623   : > { %v1621_v26 = vmul.f32 96.0, %v1539_v4  ;;  %v2072_v40 = vpop.eup %2071 }
 0x624   : > { %v1687_v18 = vmul.f32 16384.0, %v2072_v40  ;;  %vm1691_vm8 = vweird.f32 %v2072_v40 }
 0x625   : > { %v1637_v17 = vadd.f32 %v1621_v26, %v1605_v29  ;;  %v1613_v26 = vsub.f32 %v1581_v16, %v1597_v13 }
 0x626   : > { %v1688_v23 = vsub.f32 1.0, %v1687_v18 }
 0x627   : > { %v1653_v50 = vmul.f32 %v1637_v17, %v1637_v17 }
 0x628   : > { %v1689_v10 = vmul.f32 %v2072_v40, %v1688_v23 }
 0x629   : > { %v1668_v61 = vadd.f32 %v1667_v54, %v1653_v50 }
 0x62a   : > { %v1690_v43 = vadd.f32 %v2072_v40, %v1689_v10 }
 0x630   : > { %v2779_v32 = vpop.f32.mrf.mxu3 }
 0x631   : > { %v1622_v39 = vmul.f32 96.0, %v2779_v32 }
 0x633   : > { %v1638_v46 = vadd.f32 %v1622_v39, %v1606_v19 }
 0x635   : > { %v1654_v55 = vmul.f32 %v1638_v46, %v1638_v46  ;;  %v1692_v46 = vsel %vm1691_vm8, %v2072_v40, %v1690_v43 }
 0x637   : > { %v1669_v2 = vadd.f32 %v1668_v61, %v1654_v55 }
 0x638   : > { %v2781_v34 = vpop.f32.mrf.mxu3 }
 0x639   : > { %v1623_v41 = vmul.f32 96.0, %v2781_v34 }
 0x63b   : > { %v1639_v51 = vadd.f32 %v1623_v41, %v1607_v42 }
 0x640   : > { %v2785_v38 = vpop.f32.mrf.mxu3 }
 0x641   : > { %v1624_v32 = vmul.f32 96.0, %v2785_v38  ;;  %v1655_v38 = vmul.f32 %v1639_v51, %v1639_v51 }
 0x643   : > { %v1640_v56 = vadd.f32 %v1624_v32, %v1608_v47  ;;  %v1670_v7 = vadd.f32 %v1669_v2, %v1655_v38 }
 0x645   : > { %v1656_v3 = vmul.f32 %v1640_v56, %v1640_v56 }
 0x648   : > { %v2789_v11 = vpop.f32.mrf.mxu3 }
 0x649   : > { %v1625_v34 = vmul.f32 96.0, %v2789_v11 }
 0x64b   : > { %v1641_v62 = vadd.f32 %v1625_v34, %v1609_v52 }
 0x64d   : > { %v1657_v8 = vmul.f32 %v1641_v62, %v1641_v62 }
 0x650   : > { %v1554_v5 = vpop.f32.mrf.mxu3 }
 0x651   : > { %v1626_v57 = vmul.f32 96.0, %v1554_v5  ;;  %v1671_v5 = vadd.f32 %v1670_v7, %v1656_v3 }
 0x653   : > { %v1642_v4 = vadd.f32 %v1626_v57, %v1610_v58  ;;  %v1672_v20 = vadd.f32 %v1671_v5, %v1657_v8 }
 0x655   : > { %v1658_v14 = vmul.f32 %v1642_v4, %v1642_v4 }
 0x657   : > { %v1673_v29 = vadd.f32 %v1672_v20, %v1658_v14 }
 0x658   : > { %v1557_v28 = vpop.f32.mrf.mxu3 }
 0x659   : > { %v1627_v63 = vmul.f32 96.0, %v1557_v28 }
 0x65b   : > { %v1643_v9 = vadd.f32 %v1627_v63, %v1611_v27 }
 0x65d   : > { %v1659_v21 = vmul.f32 %v1643_v9, %v1643_v9 }
 0x65f   : > { %v1674_v37 = vadd.f32 %v1673_v29, %v1659_v21 }
 0x660   : > { %v1560_v1 = vpop.f32.mrf.mxu3 }
 0x661   : > { %v1628_v11 = vmul.f32 96.0, %v1560_v1 }
 0x663   : > { %v1644_v15 = vadd.f32 %v1628_v11, %v1612_v60 }
 0x665   : > { %v1660_v30 = vmul.f32 %v1644_v15, %v1644_v15 }
 0x667   : > { %v1675_v39 = vadd.f32 %v1674_v37, %v1660_v30 }
 0x668   : > { %v1563_v25 = vpop.f32.mrf.mxu3 }
 0x669   : > { %v1629_v33 = vmul.f32 96.0, %v1563_v25 }
 0x66b   : > { %v1645_v35 = vadd.f32 %v1629_v33, %v1613_v26 }
 0x66d   : > { %v1661_v22 = vmul.f32 %v1645_v35, %v1645_v35 }
 0x66f   : > { %v1676_v19 = vadd.f32 %v1675_v39, %v1661_v22 }
 0x671   : > { %1677 = vadd.xlane.f32.xlu1 %v1676_v19 }
 0x6e4   : > { %v1678_v17 = vpop.xlane.xlu1 %1677 }
 0x6e5   : > { %v1679_v41 = vrot.slane %v1678_v17, 4 }
 0x6e7   : > { %v1680_v42 = vadd.f32 %v1679_v41, %v1678_v17 }
 0x6e9   : > { %v1681_v12 = vrot.slane %v1680_v42, 2 }
 0x6eb   : > { %v1682_v28 = vadd.f32 %v1681_v12, %v1680_v42 }
 0x6ed   : > { %v1683_v44 = vrot.slane %v1682_v28, 1 }
 0x6ef   : > { %v1684_v45 = vadd.f32 %v1683_v44, %v1682_v28 }
 0x6f1   : > { %1988 = vpush %v1684_v45 }
 0x6f2   : > { %1990 = vpush %v1692_v46 }
 0x722   : > { %s1989_s25 = spop %1988 }
 0x723   : > { %s1991_s13 = spop %1990 }
 0x724   : > { %s1694_s28 = smul.f32 %s1991_s13, %s1989_s25 }
 0x726   : > { %v1695_v32 = vstv %s1694_s28 }
 0x727   : > { %1697 = vst.msk [vmem:[#allocation13] sm:$0x1] %vm1696_vm9, %v1695_v32 }
 0x728 PF: > { %p2003_p10 = scmp.eq.s32.totalorder %s2363_s22, 2  ;;  %s2303_s23 = smov [#allocation13]  }
 0x729   : > { %s1704_s18 = sshll.u32 %s2303_s23, 4  ;;  %s2845_s9 = sld [smem:[#allocation23_spill]]  ;;  %s1705_s18 = int_to_ptr.vmem [resolvable:$true] %s1704_s18 }
 0x72f   : > { %s1706_s14 = sshll.u32 %s2845_s9, 4  ;;  %s1707_s14 = int_to_ptr.hbm [resolvable:$true] %s1706_s14 }
 0x730   : > { %2000 = dma.vmem_to_hbm [thread:$0]  (%p2003_p10), %s1705_s18, 16, %s1707_s14, [#allocation7]  }
 0x731   : > { %2265 = dma.done.wait (%p2003_p10), [#allocation7], 16  }
 0x732   : > { %2267 = vsyncadd (%p2003_p10), [#allocation7], 4294967280 }
 0x733 PF: > { %s2846_s21 = sld [smem:[#allocation19_spill]]  ;;  %s2850_s15 = smov %s2274_s16 }
 0x734   : > { %s2847_s11 = sld [smem:[#allocation21_spill]]  ;;  %s2851_s16 = smov %s2278_s17 }
 0x735   : > { %s2848_s20 = sld [smem:[#allocation18_spill]]  ;;  %s2853_s18 = smov %s2286_s19 }
 0x736   : > { %s2849_s27 = sld [smem:[#allocation20_spill]] }
 0x739   : > { %p21_p12 = scmp.ge.s32.totalorder %s2846_s21, 5  }
 0x73a   : > { %s2852_s17 = smov %s2847_s11 }
 0x73b   : > { %s2854_s19 = smov %s2848_s20  ;;  %23 = sbr.rel (!%p21_p12) target bundleno = 13 (0xd), region = 126 }
 0x73c   : > { %s2855_s20 = smov %s2849_s27 }
 0x740   :  { %1720 = vsyncpa [#allocation6], 1 }
 0x741   :  { %1722 = vsyncpa [#allocation6 + $0x1], 1 }
 0x742   :  { %1723 = vsyncpa [#allocation9], 1 }
 0x743   :  { %1725 = vsyncpa [#allocation9 + $0x1], 1 }
 0x744   :  { %1726 = vsyncpa [#allocation12], 1 }
 0x745   :  { %1728 = vsyncpa [#allocation12 + $0x1], 1 }
 0x746   :  { %1729 = vsyncpa [#allocation7], 1 }
 0x747   :  { %1731 = vsyncpa [#allocation7 + $0x1], 1 }

</bundles_post_ra>
